<compile_context>
chip_gen: v7x
topology: tpu7x:2x2x1
jax: 0.10.0
libtpu: 0.0.40
codegen_flags: <defaults>
</compile_context>

<pallas_src>
import functools

import jax
import jax.numpy as jnp
from jax import lax
from jax.experimental import pallas as pl
from jax.experimental.pallas import tpu as pltpu


def _encoder_layer_kernel(x_ref, mask_ref,
                          wqkv_ref, bqkv_ref, wout_ref, bout_ref,
                          g1_ref, beta1_ref,
                          w1_ref, b1_ref, w2_ref, b2_ref,
                          g2_ref, beta2_ref,
                          o_ref, *, num_heads, block_batch):
    f32 = jnp.float32
    bf16 = jnp.bfloat16

    xb = x_ref[...]                                    # (Bb, T, D) f32
    Bb, T, D = xb.shape
    R = Bb * T
    hd = D // num_heads

    # Flatten the batch block into rows: every GEMM outside the softmax loop
    # runs on the full (Bb*T, D) slab.
    x = xb.reshape(R, D)
    x_bf = x.astype(bf16)

    # ---- fused QKV projection: one (R, D) x (D, 3D) MXU matmul ----
    # (1/sqrt(d_k) is already folded into the Q columns of wqkv / bqkv.)
    qkv = jnp.dot(x_bf, wqkv_ref[...], preferred_element_type=f32) + bqkv_ref[...]
    qkv_bf = qkv.astype(bf16)                          # cast once, reused by all heads

    mask = mask_ref[...]                               # (Bb, T, T), 1.0 == masked

    # ---- attention + output projection (concat-free) ----
    ctx_rows = []
    for b in range(block_batch):
        r0 = b * T
        # additive mask bias, hoisted out of the per-head loop
        bias = jnp.where(mask[b] > 0.5, f32(-10000.0), f32(0.0))      # (T, T)
        acc = None
        for h in range(num_heads):
            c0 = h * hd
            qh = qkv_bf[r0:r0 + T, c0:c0 + hd]
            kh = qkv_bf[r0:r0 + T, D + c0:D + c0 + hd]
            vh = qkv_bf[r0:r0 + T, 2 * D + c0:2 * D + c0 + hd]
            # contract last dims directly: no explicit k.T / XLU transpose
            s = lax.dot_general(qh, kh, (((1,), (1,)), ((), ())),
                                preferred_element_type=f32) + bias    # (T, T)
            s = s - jnp.max(s, axis=-1, keepdims=True)
            p = jnp.exp(s)
            p = p * pl.reciprocal(jnp.sum(p, axis=-1, keepdims=True), approx=True)
            oh = jnp.dot(p.astype(bf16), vh, preferred_element_type=f32)   # (T, hd)
            # fold the head-concat into the output projection:
            #   ctx += head_out @ W_out[h*hd:(h+1)*hd, :]
            proj = jnp.dot(oh.astype(bf16), wout_ref[c0:c0 + hd, :],
                           preferred_element_type=f32)                     # (T, D)
            acc = proj if acc is None else acc + proj
        ctx_rows.append(acc)
    ctx = jnp.concatenate(ctx_rows, axis=0) if block_batch > 1 else ctx_rows[0]
    ctx = ctx + bout_ref[...]                                              # (R, D)

    # ---- residual + LayerNorm1 (f32) ----
    h1 = x + ctx
    mu = jnp.mean(h1, axis=-1, keepdims=True)
    var = jnp.mean((h1 - mu) * (h1 - mu), axis=-1, keepdims=True)
    h1 = (h1 - mu) * lax.rsqrt(var + 1e-5) * g1_ref[...] + beta1_ref[...]

    # ---- position-wise FFN: 1x1 convs == linears, ReLU between ----
    f = jnp.dot(h1.astype(bf16), w1_ref[...],
                preferred_element_type=f32) + b1_ref[...]
    f = jnp.maximum(f, 0.0)
    f = jnp.dot(f.astype(bf16), w2_ref[...],
                preferred_element_type=f32) + b2_ref[...]

    # ---- residual + LayerNorm2 (f32) ----
    h2 = h1 + f
    mu2 = jnp.mean(h2, axis=-1, keepdims=True)
    var2 = jnp.mean((h2 - mu2) * (h2 - mu2), axis=-1, keepdims=True)
    out = (h2 - mu2) * lax.rsqrt(var2 + 1e-5) * g2_ref[...] + beta2_ref[...]

    o_ref[...] = out.reshape(Bb, T, D).astype(o_ref.dtype)


def encoder_layer(enc_in, attn_mask, params, *, num_heads, block_batch=None):
    """enc_in: (B, T, D) f32; attn_mask: (B, T, T) f32 with 1.0 == masked."""
    B, T, D = enc_in.shape
    Dff = params["w1"].shape[1]

    if block_batch is None:
        # Target >=128 rows per grid step so the projection/FFN GEMMs fill the
        # MXU.  (On v7x, explicitly pick block_batch so the grid has >=2 steps
        # for the 2 TensorCores.)
        block_batch = max(1, min(B, pl.cdiv(128, T)))
        while B % block_batch:
            block_batch -= 1
    assert B % block_batch == 0
    grid = (B // block_batch,)

    # TODO(synk): for a pure key-padding mask, pass (B, T) seq-lens via scalar
    # prefetch and build the (T, T) bias in-kernel to avoid O(T^2) mask traffic;
    # the dense (B, T, T) mask is kept here to preserve the module's semantics.

    def full(shape):
        return pl.BlockSpec(shape, lambda i: (0,) * len(shape))

    kernel = functools.partial(_encoder_layer_kernel,
                               num_heads=num_heads, block_batch=block_batch)

    return pl.pallas_call(
        kernel,
        out_shape=jax.ShapeDtypeStruct((B, T, D), jnp.float32),
        grid=grid,
        in_specs=[
            pl.BlockSpec((block_batch, T, D), lambda i: (i, 0, 0)),   # x
            pl.BlockSpec((block_batch, T, T), lambda i: (i, 0, 0)),   # mask
            full((D, 3 * D)),   # fused Wqkv (bf16, Q-slab pre-scaled)
            full((1, 3 * D)),   # fused bqkv
            full((D, D)),       # W_out (bf16)
            full((1, D)),       # b_out
            full((1, D)),       # norm1 gamma
            full((1, D)),       # norm1 beta
            full((D, Dff)),     # FFN conv1 weight (bf16)
            full((1, Dff)),     # FFN conv1 bias
            full((Dff, D)),     # FFN conv2 weight (bf16)
            full((1, D)),       # FFN conv2 bias
            full((1, D)),       # norm2 gamma
            full((1, D)),       # norm2 beta
        ],
        out_specs=pl.BlockSpec((block_batch, T, D), lambda i: (i, 0, 0)),
        compiler_params=pltpu.CompilerParams(
            dimension_semantics=("parallel",),
            vmem_limit_bytes=32 * 1024 * 1024),
    )(enc_in, attn_mask,
      params["wqkv"], params["bqkv"], params["wout"], params["bout"],
      params["g1"], params["beta1"],
      params["w1"], params["b1"], params["w2"], params["b2"],
      params["g2"], params["beta2"])


def init_params(key, dim, num_heads, dff):
    hd = dim // num_heads
    ks = jax.random.split(key, 6)
    std_qk = (2.0 / (dim + hd)) ** 0.5    # matches nn.init.normal_ std in the module
    std_v = (2.0 / (dim + hd)) ** 0.5

    wq = std_qk * jax.random.normal(ks[0], (dim, dim), jnp.float32)
    wk = std_qk * jax.random.normal(ks[1], (dim, dim), jnp.float32)
    wv = std_v * jax.random.normal(ks[2], (dim, dim), jnp.float32)
    wout = std_v * jax.random.normal(ks[3], (dim, dim), jnp.float32)
    w1 = (1.0 / dim) ** 0.5 * jax.random.normal(ks[4], (dim, dff), jnp.float32)
    w2 = (1.0 / dff) ** 0.5 * jax.random.normal(ks[5], (dff, dim), jnp.float32)

    # Fold the 1/sqrt(d_k) attention-score scale into W_Q (and b_Q) so the
    # kernel never multiplies the per-head (T, T) score tiles.
    scale = 1.0 / (hd ** 0.5)
    wq = wq * scale
    bq = jnp.zeros((dim,), jnp.float32) * scale
    bk = jnp.zeros((dim,), jnp.float32)
    bv = jnp.zeros((dim,), jnp.float32)

    def b(n):
        return jnp.zeros((1, n), jnp.float32)

    return {
        # fused QKV weight/bias (D, 3D) / (1, 3D); Q slab pre-scaled by 1/sqrt(d_k)
        "wqkv": jnp.concatenate([wq, wk, wv], axis=1).astype(jnp.bfloat16),
        "bqkv": jnp.concatenate([bq, bk, bv], axis=0)[None, :],
        "wout": wout.astype(jnp.bfloat16),
        "bout": b(dim),
        "g1": jnp.ones((1, dim), jnp.float32),
        "beta1": b(dim),
        "w1": w1.astype(jnp.bfloat16),
        "b1": b(dff),
        "w2": w2.astype(jnp.bfloat16),
        "b2": b(dim),
        "g2": jnp.ones((1, dim), jnp.float32),
        "beta2": b(dim),
    }


if __name__ == "__main__":
    # EncoderLayer(dim=256, n=2, dff=512, dropout_posffn=0.0, dropout_attn=0.0)
    B, T, DIM, HEADS, DFF = 2, 8, 256, 2, 512

    key = jax.random.PRNGKey(0)
    k_x, k_par = jax.random.split(key, 2)

    enc_in = jax.random.normal(k_x, (B, T, DIM), jnp.float32)

    # key-padding attention mask (1.0 == masked), matching the torch bool mask
    seq_lens = jnp.array([T, 5], dtype=jnp.int32)
    col = jnp.arange(T)
    attn_mask = jnp.broadcast_to(
        (col[None, :] >= seq_lens[:, None]).astype(jnp.float32)[:, None, :],
        (B, T, T))

    params = init_params(k_par, DIM, HEADS, DFF)

    out = encoder_layer(enc_in, attn_mask, params, num_heads=HEADS)
    out = jax.block_until_ready(out)

    assert out.shape == (B, T, DIM), out.shape
    assert bool(jnp.all(jnp.isfinite(out)))
    print("KERNEL_OK")
</pallas_src>

<mosaic_0001>
module attributes {stable_mosaic.version = 11 : i64} {
  func.func @_encoder_layer_kernel(%arg0: i32, %arg1: memref<2x8x256xf32, #tpu.memory_space<vmem>>, %arg2: memref<2x8x8xf32, #tpu.memory_space<vmem>>, %arg3: memref<256x768xbf16, #tpu.memory_space<vmem>>, %arg4: memref<1x768xf32, #tpu.memory_space<vmem>>, %arg5: memref<256x256xbf16, #tpu.memory_space<vmem>>, %arg6: memref<1x256xf32, #tpu.memory_space<vmem>>, %arg7: memref<1x256xf32, #tpu.memory_space<vmem>>, %arg8: memref<1x256xf32, #tpu.memory_space<vmem>>, %arg9: memref<256x512xbf16, #tpu.memory_space<vmem>>, %arg10: memref<1x512xf32, #tpu.memory_space<vmem>>, %arg11: memref<512x256xbf16, #tpu.memory_space<vmem>>, %arg12: memref<1x256xf32, #tpu.memory_space<vmem>>, %arg13: memref<1x256xf32, #tpu.memory_space<vmem>>, %arg14: memref<1x256xf32, #tpu.memory_space<vmem>>, %arg15: memref<2x8x256xf32, #tpu.memory_space<vmem>>) attributes {dimension_semantics = [#tpu.dimension_semantics<parallel>], iteration_bounds = array<i64: 1>, scalar_prefetch = 0 : i64, scratch_operands = 0 : i64, tpu.core_type = #tpu.core_type<tc>, window_params = [{transform_indices = @transform_0, window_bounds = array<i64: 2, 8, 256>}, {transform_indices = @transform_1, window_bounds = array<i64: 2, 8, 8>}, {pipeline_mode = #tpu.pipeline_mode<synchronous>, transform_indices = @transform_2, window_bounds = array<i64: 256, 768>}, {pipeline_mode = #tpu.pipeline_mode<synchronous>, transform_indices = @transform_3, window_bounds = array<i64: 1, 768>}, {pipeline_mode = #tpu.pipeline_mode<synchronous>, transform_indices = @transform_4, window_bounds = array<i64: 256, 256>}, {pipeline_mode = #tpu.pipeline_mode<synchronous>, transform_indices = @transform_5, window_bounds = array<i64: 1, 256>}, {pipeline_mode = #tpu.pipeline_mode<synchronous>, transform_indices = @transform_6, window_bounds = array<i64: 1, 256>}, {pipeline_mode = #tpu.pipeline_mode<synchronous>, transform_indices = @transform_7, window_bounds = array<i64: 1, 256>}, {pipeline_mode = #tpu.pipeline_mode<synchronous>, transform_indices = @transform_8, window_bounds = array<i64: 256, 512>}, {pipeline_mode = #tpu.pipeline_mode<synchronous>, transform_indices = @transform_9, window_bounds = array<i64: 1, 512>}, {pipeline_mode = #tpu.pipeline_mode<synchronous>, transform_indices = @transform_10, window_bounds = array<i64: 512, 256>}, {pipeline_mode = #tpu.pipeline_mode<synchronous>, transform_indices = @transform_11, window_bounds = array<i64: 1, 256>}, {pipeline_mode = #tpu.pipeline_mode<synchronous>, transform_indices = @transform_12, window_bounds = array<i64: 1, 256>}, {pipeline_mode = #tpu.pipeline_mode<synchronous>, transform_indices = @transform_13, window_bounds = array<i64: 1, 256>}, {transform_indices = @transform_14, window_bounds = array<i64: 2, 8, 256>}]} {
    %c0 = arith.constant 0 : index
    %c0_0 = arith.constant 0 : index
    %c0_1 = arith.constant 0 : index
    %0 = vector.load %arg1[%c0, %c0_0, %c0_1] : memref<2x8x256xf32, #tpu.memory_space<vmem>>, vector<2x8x256xf32>
    %1 = vector.shape_cast %0 : vector<2x8x256xf32> to vector<16x256xf32>
    %2 = arith.truncf %1 : vector<16x256xf32> to vector<16x256xbf16>
    %c0_2 = arith.constant 0 : index
    %c0_3 = arith.constant 0 : index
    %3 = vector.load %arg3[%c0_2, %c0_3] : memref<256x768xbf16, #tpu.memory_space<vmem>>, vector<256x768xbf16>
    %cst = arith.constant dense<0.000000e+00> : vector<16x768xf32>
    %4 = tpu.matmul %2, %3, %cst {dimension_numbers = #tpu.dot_dimension_numbers<[1], [0], [0], [1], [0, 0, 1, 1], [], []>} : vector<16x256xbf16>, vector<256x768xbf16>, vector<16x768xf32> -> vector<16x768xf32>
    %c0_4 = arith.constant 0 : index
    %c0_5 = arith.constant 0 : index
    %5 = vector.load %arg4[%c0_4, %c0_5] : memref<1x768xf32, #tpu.memory_space<vmem>>, vector<1x768xf32>
    %6 = vector.broadcast %5 : vector<1x768xf32> to vector<16x768xf32>
    %7 = arith.addf %4, %6 : vector<16x768xf32>
    %8 = arith.truncf %7 : vector<16x768xf32> to vector<16x768xbf16>
    %c0_6 = arith.constant 0 : index
    %c0_7 = arith.constant 0 : index
    %c0_8 = arith.constant 0 : index
    %9 = vector.load %arg2[%c0_6, %c0_7, %c0_8] : memref<2x8x8xf32, #tpu.memory_space<vmem>>, vector<2x8x8xf32>
    %10 = vector.extract_strided_slice %9 {offsets = [0, 0, 0], sizes = [1, 8, 8], strides = [1, 1, 1]} : vector<2x8x8xf32> to vector<1x8x8xf32>
    %11 = vector.shape_cast %10 : vector<1x8x8xf32> to vector<8x8xf32>
    %cst_9 = arith.constant 5.000000e-01 : f32
    %12 = vector.broadcast %cst_9 : f32 to vector<8x8xf32>
    %13 = arith.cmpf ogt, %11, %12 : vector<8x8xf32>
    %cst_10 = arith.constant -1.000000e+04 : f32
    %cst_11 = arith.constant 0.000000e+00 : f32
    %14 = vector.broadcast %cst_10 : f32 to vector<8x8xf32>
    %15 = vector.broadcast %cst_11 : f32 to vector<8x8xf32>
    %16 = arith.select %13, %14, %15 : vector<8x8xi1>, vector<8x8xf32>
    %17 = vector.extract_strided_slice %8 {offsets = [0, 0], sizes = [8, 128], strides = [1, 1]} : vector<16x768xbf16> to vector<8x128xbf16>
    %18 = vector.extract_strided_slice %8 {offsets = [0, 256], sizes = [8, 128], strides = [1, 1]} : vector<16x768xbf16> to vector<8x128xbf16>
    %19 = vector.extract_strided_slice %8 {offsets = [0, 512], sizes = [8, 128], strides = [1, 1]} : vector<16x768xbf16> to vector<8x128xbf16>
    %cst_12 = arith.constant dense<0.000000e+00> : vector<8x8xf32>
    %20 = tpu.matmul %17, %18, %cst_12 {dimension_numbers = #tpu.dot_dimension_numbers<[1], [1], [0], [0], [0, 0, 1, 0], [], []>} : vector<8x128xbf16>, vector<8x128xbf16>, vector<8x8xf32> -> vector<8x8xf32>
    %21 = arith.addf %20, %16 : vector<8x8xf32>
    %cst_13 = arith.constant dense<0xFF800000> : vector<8xf32>
    %22 = vector.multi_reduction <maximumf>, %21, %cst_13 [1] : vector<8x8xf32> to vector<8xf32>
    %23 = vector.shape_cast %22 : vector<8xf32> to vector<8x1xf32>
    %24 = vector.broadcast %23 : vector<8x1xf32> to vector<8x8xf32>
    %25 = arith.subf %21, %24 : vector<8x8xf32>
    %26 = math.exp %25 : vector<8x8xf32>
    %cst_14 = arith.constant dense<0.000000e+00> : vector<8xf32>
    %27 = vector.multi_reduction <add>, %26, %cst_14 [1] : vector<8x8xf32> to vector<8xf32>
    %28 = vector.shape_cast %27 : vector<8xf32> to vector<8x1xf32>
    %29 = tpu.reciprocal %28 {approx = true} : vector<8x1xf32> -> vector<8x1xf32>
    %30 = vector.broadcast %29 : vector<8x1xf32> to vector<8x8xf32>
    %31 = arith.mulf %26, %30 : vector<8x8xf32>
    %32 = arith.truncf %31 : vector<8x8xf32> to vector<8x8xbf16>
    %cst_15 = arith.constant dense<0.000000e+00> : vector<8x128xf32>
    %33 = tpu.matmul %32, %19, %cst_15 {dimension_numbers = #tpu.dot_dimension_numbers<[1], [0], [0], [1], [0, 0, 1, 1], [], []>} : vector<8x8xbf16>, vector<8x128xbf16>, vector<8x128xf32> -> vector<8x128xf32>
    %34 = arith.truncf %33 : vector<8x128xf32> to vector<8x128xbf16>
    %c0_16 = arith.constant 0 : index
    %c0_17 = arith.constant 0 : index
    %35 = vector.load %arg5[%c0_16, %c0_17] : memref<256x256xbf16, #tpu.memory_space<vmem>>, vector<128x256xbf16>
    %cst_18 = arith.constant dense<0.000000e+00> : vector<8x256xf32>
    %36 = tpu.matmul %34, %35, %cst_18 {dimension_numbers = #tpu.dot_dimension_numbers<[1], [0], [0], [1], [0, 0, 1, 1], [], []>} : vector<8x128xbf16>, vector<128x256xbf16>, vector<8x256xf32> -> vector<8x256xf32>
    %37 = vector.extract_strided_slice %8 {offsets = [0, 128], sizes = [8, 128], strides = [1, 1]} : vector<16x768xbf16> to vector<8x128xbf16>
    %38 = vector.extract_strided_slice %8 {offsets = [0, 384], sizes = [8, 128], strides = [1, 1]} : vector<16x768xbf16> to vector<8x128xbf16>
    %39 = vector.extract_strided_slice %8 {offsets = [0, 640], sizes = [8, 128], strides = [1, 1]} : vector<16x768xbf16> to vector<8x128xbf16>
    %cst_19 = arith.constant dense<0.000000e+00> : vector<8x8xf32>
    %40 = tpu.matmul %37, %38, %cst_19 {dimension_numbers = #tpu.dot_dimension_numbers<[1], [1], [0], [0], [0, 0, 1, 0], [], []>} : vector<8x128xbf16>, vector<8x128xbf16>, vector<8x8xf32> -> vector<8x8xf32>
    %41 = arith.addf %40, %16 : vector<8x8xf32>
    %cst_20 = arith.constant dense<0xFF800000> : vector<8xf32>
    %42 = vector.multi_reduction <maximumf>, %41, %cst_20 [1] : vector<8x8xf32> to vector<8xf32>
    %43 = vector.shape_cast %42 : vector<8xf32> to vector<8x1xf32>
    %44 = vector.broadcast %43 : vector<8x1xf32> to vector<8x8xf32>
    %45 = arith.subf %41, %44 : vector<8x8xf32>
    %46 = math.exp %45 : vector<8x8xf32>
    %cst_21 = arith.constant dense<0.000000e+00> : vector<8xf32>
    %47 = vector.multi_reduction <add>, %46, %cst_21 [1] : vector<8x8xf32> to vector<8xf32>
    %48 = vector.shape_cast %47 : vector<8xf32> to vector<8x1xf32>
    %49 = tpu.reciprocal %48 {approx = true} : vector<8x1xf32> -> vector<8x1xf32>
    %50 = vector.broadcast %49 : vector<8x1xf32> to vector<8x8xf32>
    %51 = arith.mulf %46, %50 : vector<8x8xf32>
    %52 = arith.truncf %51 : vector<8x8xf32> to vector<8x8xbf16>
    %cst_22 = arith.constant dense<0.000000e+00> : vector<8x128xf32>
    %53 = tpu.matmul %52, %39, %cst_22 {dimension_numbers = #tpu.dot_dimension_numbers<[1], [0], [0], [1], [0, 0, 1, 1], [], []>} : vector<8x8xbf16>, vector<8x128xbf16>, vector<8x128xf32> -> vector<8x128xf32>
    %54 = arith.truncf %53 : vector<8x128xf32> to vector<8x128xbf16>
    %c128 = arith.constant 128 : index
    %c0_23 = arith.constant 0 : index
    %55 = vector.load %arg5[%c128, %c0_23] : memref<256x256xbf16, #tpu.memory_space<vmem>>, vector<128x256xbf16>
    %cst_24 = arith.constant dense<0.000000e+00> : vector<8x256xf32>
    %56 = tpu.matmul %54, %55, %cst_24 {dimension_numbers = #tpu.dot_dimension_numbers<[1], [0], [0], [1], [0, 0, 1, 1], [], []>} : vector<8x128xbf16>, vector<128x256xbf16>, vector<8x256xf32> -> vector<8x256xf32>
    %57 = arith.addf %36, %56 : vector<8x256xf32>
    %58 = vector.extract_strided_slice %9 {offsets = [1, 0, 0], sizes = [1, 8, 8], strides = [1, 1, 1]} : vector<2x8x8xf32> to vector<1x8x8xf32>
    %59 = vector.shape_cast %58 : vector<1x8x8xf32> to vector<8x8xf32>
    %cst_25 = arith.constant 5.000000e-01 : f32
    %60 = vector.broadcast %cst_25 : f32 to vector<8x8xf32>
    %61 = arith.cmpf ogt, %59, %60 : vector<8x8xf32>
    %cst_26 = arith.constant -1.000000e+04 : f32
    %cst_27 = arith.constant 0.000000e+00 : f32
    %62 = vector.broadcast %cst_26 : f32 to vector<8x8xf32>
    %63 = vector.broadcast %cst_27 : f32 to vector<8x8xf32>
    %64 = arith.select %61, %62, %63 : vector<8x8xi1>, vector<8x8xf32>
    %65 = vector.extract_strided_slice %8 {offsets = [8, 0], sizes = [8, 128], strides = [1, 1]} : vector<16x768xbf16> to vector<8x128xbf16>
    %66 = vector.extract_strided_slice %8 {offsets = [8, 256], sizes = [8, 128], strides = [1, 1]} : vector<16x768xbf16> to vector<8x128xbf16>
    %67 = vector.extract_strided_slice %8 {offsets = [8, 512], sizes = [8, 128], strides = [1, 1]} : vector<16x768xbf16> to vector<8x128xbf16>
    %cst_28 = arith.constant dense<0.000000e+00> : vector<8x8xf32>
    %68 = tpu.matmul %65, %66, %cst_28 {dimension_numbers = #tpu.dot_dimension_numbers<[1], [1], [0], [0], [0, 0, 1, 0], [], []>} : vector<8x128xbf16>, vector<8x128xbf16>, vector<8x8xf32> -> vector<8x8xf32>
    %69 = arith.addf %68, %64 : vector<8x8xf32>
    %cst_29 = arith.constant dense<0xFF800000> : vector<8xf32>
    %70 = vector.multi_reduction <maximumf>, %69, %cst_29 [1] : vector<8x8xf32> to vector<8xf32>
    %71 = vector.shape_cast %70 : vector<8xf32> to vector<8x1xf32>
    %72 = vector.broadcast %71 : vector<8x1xf32> to vector<8x8xf32>
    %73 = arith.subf %69, %72 : vector<8x8xf32>
    %74 = math.exp %73 : vector<8x8xf32>
    %cst_30 = arith.constant dense<0.000000e+00> : vector<8xf32>
    %75 = vector.multi_reduction <add>, %74, %cst_30 [1] : vector<8x8xf32> to vector<8xf32>
    %76 = vector.shape_cast %75 : vector<8xf32> to vector<8x1xf32>
    %77 = tpu.reciprocal %76 {approx = true} : vector<8x1xf32> -> vector<8x1xf32>
    %78 = vector.broadcast %77 : vector<8x1xf32> to vector<8x8xf32>
    %79 = arith.mulf %74, %78 : vector<8x8xf32>
    %80 = arith.truncf %79 : vector<8x8xf32> to vector<8x8xbf16>
    %cst_31 = arith.constant dense<0.000000e+00> : vector<8x128xf32>
    %81 = tpu.matmul %80, %67, %cst_31 {dimension_numbers = #tpu.dot_dimension_numbers<[1], [0], [0], [1], [0, 0, 1, 1], [], []>} : vector<8x8xbf16>, vector<8x128xbf16>, vector<8x128xf32> -> vector<8x128xf32>
    %82 = arith.truncf %81 : vector<8x128xf32> to vector<8x128xbf16>
    %c0_32 = arith.constant 0 : index
    %c0_33 = arith.constant 0 : index
    %83 = vector.load %arg5[%c0_32, %c0_33] : memref<256x256xbf16, #tpu.memory_space<vmem>>, vector<128x256xbf16>
    %cst_34 = arith.constant dense<0.000000e+00> : vector<8x256xf32>
    %84 = tpu.matmul %82, %83, %cst_34 {dimension_numbers = #tpu.dot_dimension_numbers<[1], [0], [0], [1], [0, 0, 1, 1], [], []>} : vector<8x128xbf16>, vector<128x256xbf16>, vector<8x256xf32> -> vector<8x256xf32>
    %85 = vector.extract_strided_slice %8 {offsets = [8, 128], sizes = [8, 128], strides = [1, 1]} : vector<16x768xbf16> to vector<8x128xbf16>
    %86 = vector.extract_strided_slice %8 {offsets = [8, 384], sizes = [8, 128], strides = [1, 1]} : vector<16x768xbf16> to vector<8x128xbf16>
    %87 = vector.extract_strided_slice %8 {offsets = [8, 640], sizes = [8, 128], strides = [1, 1]} : vector<16x768xbf16> to vector<8x128xbf16>
    %cst_35 = arith.constant dense<0.000000e+00> : vector<8x8xf32>
    %88 = tpu.matmul %85, %86, %cst_35 {dimension_numbers = #tpu.dot_dimension_numbers<[1], [1], [0], [0], [0, 0, 1, 0], [], []>} : vector<8x128xbf16>, vector<8x128xbf16>, vector<8x8xf32> -> vector<8x8xf32>
    %89 = arith.addf %88, %64 : vector<8x8xf32>
    %cst_36 = arith.constant dense<0xFF800000> : vector<8xf32>
    %90 = vector.multi_reduction <maximumf>, %89, %cst_36 [1] : vector<8x8xf32> to vector<8xf32>
    %91 = vector.shape_cast %90 : vector<8xf32> to vector<8x1xf32>
    %92 = vector.broadcast %91 : vector<8x1xf32> to vector<8x8xf32>
    %93 = arith.subf %89, %92 : vector<8x8xf32>
    %94 = math.exp %93 : vector<8x8xf32>
    %cst_37 = arith.constant dense<0.000000e+00> : vector<8xf32>
    %95 = vector.multi_reduction <add>, %94, %cst_37 [1] : vector<8x8xf32> to vector<8xf32>
    %96 = vector.shape_cast %95 : vector<8xf32> to vector<8x1xf32>
    %97 = tpu.reciprocal %96 {approx = true} : vector<8x1xf32> -> vector<8x1xf32>
    %98 = vector.broadcast %97 : vector<8x1xf32> to vector<8x8xf32>
    %99 = arith.mulf %94, %98 : vector<8x8xf32>
    %100 = arith.truncf %99 : vector<8x8xf32> to vector<8x8xbf16>
    %cst_38 = arith.constant dense<0.000000e+00> : vector<8x128xf32>
    %101 = tpu.matmul %100, %87, %cst_38 {dimension_numbers = #tpu.dot_dimension_numbers<[1], [0], [0], [1], [0, 0, 1, 1], [], []>} : vector<8x8xbf16>, vector<8x128xbf16>, vector<8x128xf32> -> vector<8x128xf32>
    %102 = arith.truncf %101 : vector<8x128xf32> to vector<8x128xbf16>
    %c128_39 = arith.constant 128 : index
    %c0_40 = arith.constant 0 : index
    %103 = vector.load %arg5[%c128_39, %c0_40] : memref<256x256xbf16, #tpu.memory_space<vmem>>, vector<128x256xbf16>
    %cst_41 = arith.constant dense<0.000000e+00> : vector<8x256xf32>
    %104 = tpu.matmul %102, %103, %cst_41 {dimension_numbers = #tpu.dot_dimension_numbers<[1], [0], [0], [1], [0, 0, 1, 1], [], []>} : vector<8x128xbf16>, vector<128x256xbf16>, vector<8x256xf32> -> vector<8x256xf32>
    %105 = arith.addf %84, %104 : vector<8x256xf32>
    %106 = tpu.concatenate %57, %105 in 0 : vector<8x256xf32>, vector<8x256xf32> -> vector<16x256xf32>
    %c0_42 = arith.constant 0 : index
    %c0_43 = arith.constant 0 : index
    %107 = vector.load %arg6[%c0_42, %c0_43] : memref<1x256xf32, #tpu.memory_space<vmem>>, vector<1x256xf32>
    %108 = vector.broadcast %107 : vector<1x256xf32> to vector<16x256xf32>
    %109 = arith.addf %106, %108 : vector<16x256xf32>
    %110 = arith.addf %1, %109 : vector<16x256xf32>
    %cst_44 = arith.constant dense<0.000000e+00> : vector<16xf32>
    %111 = vector.multi_reduction <add>, %110, %cst_44 [1] : vector<16x256xf32> to vector<16xf32>
    %112 = vector.shape_cast %111 : vector<16xf32> to vector<16x1xf32>
    %cst_45 = arith.constant 2.560000e+02 : f32
    %113 = vector.broadcast %cst_45 : f32 to vector<16x1xf32>
    %114 = arith.divf %112, %113 : vector<16x1xf32>
    %115 = vector.broadcast %114 : vector<16x1xf32> to vector<16x256xf32>
    %116 = arith.subf %110, %115 : vector<16x256xf32>
    %117 = vector.broadcast %114 : vector<16x1xf32> to vector<16x256xf32>
    %118 = arith.subf %110, %117 : vector<16x256xf32>
    %119 = arith.mulf %116, %118 : vector<16x256xf32>
    %cst_46 = arith.constant dense<0.000000e+00> : vector<16xf32>
    %120 = vector.multi_reduction <add>, %119, %cst_46 [1] : vector<16x256xf32> to vector<16xf32>
    %121 = vector.shape_cast %120 : vector<16xf32> to vector<16x1xf32>
    %cst_47 = arith.constant 2.560000e+02 : f32
    %122 = vector.broadcast %cst_47 : f32 to vector<16x1xf32>
    %123 = arith.divf %121, %122 : vector<16x1xf32>
    %124 = vector.broadcast %114 : vector<16x1xf32> to vector<16x256xf32>
    %125 = arith.subf %110, %124 : vector<16x256xf32>
    %cst_48 = arith.constant 9.99999974E-6 : f32
    %126 = vector.broadcast %cst_48 : f32 to vector<16x1xf32>
    %127 = arith.addf %123, %126 : vector<16x1xf32>
    %128 = math.rsqrt %127 : vector<16x1xf32>
    %129 = vector.broadcast %128 : vector<16x1xf32> to vector<16x256xf32>
    %130 = arith.mulf %125, %129 : vector<16x256xf32>
    %c0_49 = arith.constant 0 : index
    %c0_50 = arith.constant 0 : index
    %131 = vector.load %arg7[%c0_49, %c0_50] : memref<1x256xf32, #tpu.memory_space<vmem>>, vector<1x256xf32>
    %132 = vector.broadcast %131 : vector<1x256xf32> to vector<16x256xf32>
    %133 = arith.mulf %130, %132 : vector<16x256xf32>
    %c0_51 = arith.constant 0 : index
    %c0_52 = arith.constant 0 : index
    %134 = vector.load %arg8[%c0_51, %c0_52] : memref<1x256xf32, #tpu.memory_space<vmem>>, vector<1x256xf32>
    %135 = vector.broadcast %134 : vector<1x256xf32> to vector<16x256xf32>
    %136 = arith.addf %133, %135 : vector<16x256xf32>
    %137 = arith.truncf %136 : vector<16x256xf32> to vector<16x256xbf16>
    %c0_53 = arith.constant 0 : index
    %c0_54 = arith.constant 0 : index
    %138 = vector.load %arg9[%c0_53, %c0_54] : memref<256x512xbf16, #tpu.memory_space<vmem>>, vector<256x512xbf16>
    %cst_55 = arith.constant dense<0.000000e+00> : vector<16x512xf32>
    %139 = tpu.matmul %137, %138, %cst_55 {dimension_numbers = #tpu.dot_dimension_numbers<[1], [0], [0], [1], [0, 0, 1, 1], [], []>} : vector<16x256xbf16>, vector<256x512xbf16>, vector<16x512xf32> -> vector<16x512xf32>
    %c0_56 = arith.constant 0 : index
    %c0_57 = arith.constant 0 : index
    %140 = vector.load %arg10[%c0_56, %c0_57] : memref<1x512xf32, #tpu.memory_space<vmem>>, vector<1x512xf32>
    %141 = vector.broadcast %140 : vector<1x512xf32> to vector<16x512xf32>
    %142 = arith.addf %139, %141 : vector<16x512xf32>
    %cst_58 = arith.constant 0.000000e+00 : f32
    %143 = vector.broadcast %cst_58 : f32 to vector<16x512xf32>
    %144 = arith.maximumf %142, %143 : vector<16x512xf32>
    %145 = arith.truncf %144 : vector<16x512xf32> to vector<16x512xbf16>
    %c0_59 = arith.constant 0 : index
    %c0_60 = arith.constant 0 : index
    %146 = vector.load %arg11[%c0_59, %c0_60] : memref<512x256xbf16, #tpu.memory_space<vmem>>, vector<512x256xbf16>
    %cst_61 = arith.constant dense<0.000000e+00> : vector<16x256xf32>
    %147 = tpu.matmul %145, %146, %cst_61 {dimension_numbers = #tpu.dot_dimension_numbers<[1], [0], [0], [1], [0, 0, 1, 1], [], []>} : vector<16x512xbf16>, vector<512x256xbf16>, vector<16x256xf32> -> vector<16x256xf32>
    %c0_62 = arith.constant 0 : index
    %c0_63 = arith.constant 0 : index
    %148 = vector.load %arg12[%c0_62, %c0_63] : memref<1x256xf32, #tpu.memory_space<vmem>>, vector<1x256xf32>
    %149 = vector.broadcast %148 : vector<1x256xf32> to vector<16x256xf32>
    %150 = arith.addf %147, %149 : vector<16x256xf32>
    %151 = arith.addf %136, %150 : vector<16x256xf32>
    %cst_64 = arith.constant dense<0.000000e+00> : vector<16xf32>
    %152 = vector.multi_reduction <add>, %151, %cst_64 [1] : vector<16x256xf32> to vector<16xf32>
    %153 = vector.shape_cast %152 : vector<16xf32> to vector<16x1xf32>
    %cst_65 = arith.constant 2.560000e+02 : f32
    %154 = vector.broadcast %cst_65 : f32 to vector<16x1xf32>
    %155 = arith.divf %153, %154 : vector<16x1xf32>
    %156 = vector.broadcast %155 : vector<16x1xf32> to vector<16x256xf32>
    %157 = arith.subf %151, %156 : vector<16x256xf32>
    %158 = vector.broadcast %155 : vector<16x1xf32> to vector<16x256xf32>
    %159 = arith.subf %151, %158 : vector<16x256xf32>
    %160 = arith.mulf %157, %159 : vector<16x256xf32>
    %cst_66 = arith.constant dense<0.000000e+00> : vector<16xf32>
    %161 = vector.multi_reduction <add>, %160, %cst_66 [1] : vector<16x256xf32> to vector<16xf32>
    %162 = vector.shape_cast %161 : vector<16xf32> to vector<16x1xf32>
    %cst_67 = arith.constant 2.560000e+02 : f32
    %163 = vector.broadcast %cst_67 : f32 to vector<16x1xf32>
    %164 = arith.divf %162, %163 : vector<16x1xf32>
    %165 = vector.broadcast %155 : vector<16x1xf32> to vector<16x256xf32>
    %166 = arith.subf %151, %165 : vector<16x256xf32>
    %cst_68 = arith.constant 9.99999974E-6 : f32
    %167 = vector.broadcast %cst_68 : f32 to vector<16x1xf32>
    %168 = arith.addf %164, %167 : vector<16x1xf32>
    %169 = math.rsqrt %168 : vector<16x1xf32>
    %170 = vector.broadcast %169 : vector<16x1xf32> to vector<16x256xf32>
    %171 = arith.mulf %166, %170 : vector<16x256xf32>
    %c0_69 = arith.constant 0 : index
    %c0_70 = arith.constant 0 : index
    %172 = vector.load %arg13[%c0_69, %c0_70] : memref<1x256xf32, #tpu.memory_space<vmem>>, vector<1x256xf32>
    %173 = vector.broadcast %172 : vector<1x256xf32> to vector<16x256xf32>
    %174 = arith.mulf %171, %173 : vector<16x256xf32>
    %c0_71 = arith.constant 0 : index
    %c0_72 = arith.constant 0 : index
    %175 = vector.load %arg14[%c0_71, %c0_72] : memref<1x256xf32, #tpu.memory_space<vmem>>, vector<1x256xf32>
    %176 = vector.broadcast %175 : vector<1x256xf32> to vector<16x256xf32>
    %177 = arith.addf %174, %176 : vector<16x256xf32>
    %178 = vector.shape_cast %177 : vector<16x256xf32> to vector<2x8x256xf32>
    %c0_73 = arith.constant 0 : index
    %c0_74 = arith.constant 0 : index
    %c0_75 = arith.constant 0 : index
    %179 = vector.load %arg15[%c0_73, %c0_74, %c0_75] : memref<2x8x256xf32, #tpu.memory_space<vmem>>, vector<2x8x256xf32>
    tpu.vector_store %arg15[%c0_73, %c0_74, %c0_75], %178 {strides = array<i32>} : memref<2x8x256xf32, #tpu.memory_space<vmem>>, vector<2x8x256xf32>,
    return
  }
  func.func @transform_0(%arg0: i32) -> (i32, i32, i32) {
    %c0_i32 = arith.constant 0 : i32
    %c0_i32_0 = arith.constant 0 : i32
    %c0_i32_1 = arith.constant 0 : i32
    return %arg0, %c0_i32, %c0_i32_0 : i32, i32, i32
  }
  func.func @transform_1(%arg0: i32) -> (i32, i32, i32) {
    %c0_i32 = arith.constant 0 : i32
    %c0_i32_0 = arith.constant 0 : i32
    %c0_i32_1 = arith.constant 0 : i32
    return %arg0, %c0_i32, %c0_i32_0 : i32, i32, i32
  }
  func.func @transform_2(%arg0: i32) -> (i32, i32) {
    %c0_i32 = arith.constant 0 : i32
    %c0_i32_0 = arith.constant 0 : i32
    %c0_i32_1 = arith.constant 0 : i32
    return %c0_i32, %c0_i32_0 : i32, i32
  }
  func.func @transform_3(%arg0: i32) -> (i32, i32) {
    %c0_i32 = arith.constant 0 : i32
    %c0_i32_0 = arith.constant 0 : i32
    %c0_i32_1 = arith.constant 0 : i32
    return %c0_i32, %c0_i32_0 : i32, i32
  }
  func.func @transform_4(%arg0: i32) -> (i32, i32) {
    %c0_i32 = arith.constant 0 : i32
    %c0_i32_0 = arith.constant 0 : i32
    %c0_i32_1 = arith.constant 0 : i32
    return %c0_i32, %c0_i32_0 : i32, i32
  }
  func.func @transform_5(%arg0: i32) -> (i32, i32) {
    %c0_i32 = arith.constant 0 : i32
    %c0_i32_0 = arith.constant 0 : i32
    %c0_i32_1 = arith.constant 0 : i32
    return %c0_i32, %c0_i32_0 : i32, i32
  }
  func.func @transform_6(%arg0: i32) -> (i32, i32) {
    %c0_i32 = arith.constant 0 : i32
    %c0_i32_0 = arith.constant 0 : i32
    %c0_i32_1 = arith.constant 0 : i32
    return %c0_i32, %c0_i32_0 : i32, i32
  }
  func.func @transform_7(%arg0: i32) -> (i32, i32) {
    %c0_i32 = arith.constant 0 : i32
    %c0_i32_0 = arith.constant 0 : i32
    %c0_i32_1 = arith.constant 0 : i32
    return %c0_i32, %c0_i32_0 : i32, i32
  }
  func.func @transform_8(%arg0: i32) -> (i32, i32) {
    %c0_i32 = arith.constant 0 : i32
    %c0_i32_0 = arith.constant 0 : i32
    %c0_i32_1 = arith.constant 0 : i32
    return %c0_i32, %c0_i32_0 : i32, i32
  }
  func.func @transform_9(%arg0: i32) -> (i32, i32) {
    %c0_i32 = arith.constant 0 : i32
    %c0_i32_0 = arith.constant 0 : i32
    %c0_i32_1 = arith.constant 0 : i32
    return %c0_i32, %c0_i32_0 : i32, i32
  }
  func.func @transform_10(%arg0: i32) -> (i32, i32) {
    %c0_i32 = arith.constant 0 : i32
    %c0_i32_0 = arith.constant 0 : i32
    %c0_i32_1 = arith.constant 0 : i32
    return %c0_i32, %c0_i32_0 : i32, i32
  }
  func.func @transform_11(%arg0: i32) -> (i32, i32) {
    %c0_i32 = arith.constant 0 : i32
    %c0_i32_0 = arith.constant 0 : i32
    %c0_i32_1 = arith.constant 0 : i32
    return %c0_i32, %c0_i32_0 : i32, i32
  }
  func.func @transform_12(%arg0: i32) -> (i32, i32) {
    %c0_i32 = arith.constant 0 : i32
    %c0_i32_0 = arith.constant 0 : i32
    %c0_i32_1 = arith.constant 0 : i32
    return %c0_i32, %c0_i32_0 : i32, i32
  }
  func.func @transform_13(%arg0: i32) -> (i32, i32) {
    %c0_i32 = arith.constant 0 : i32
    %c0_i32_0 = arith.constant 0 : i32
    %c0_i32_1 = arith.constant 0 : i32
    return %c0_i32, %c0_i32_0 : i32, i32
  }
  func.func @transform_14(%arg0: i32) -> (i32, i32, i32) {
    %c0_i32 = arith.constant 0 : i32
    %c0_i32_0 = arith.constant 0 : i32
    %c0_i32_1 = arith.constant 0 : i32
    return %arg0, %c0_i32, %c0_i32_0 : i32, i32, i32
  }
}

</mosaic_0001>

<bundles_post_ra>
// kernel: tpu_custom_call.1
= control target key start
LH: loop header
LB: loop body
LE: loop exit
PB: predicated region body
PF: predicated region fallthrough
CT: control target
= control target key end

     0   :  { %19 = vsyncpa [#allocation3], 0  ;;  %s4205_s0 = inlined_call_operand.hbm [shape: f32[2,8,256], index: 0, kind: input, shape index: {}]   ;;  %s4206_s1 = inlined_call_operand.hbm [shape: f32[2,8,8], index: 1, kind: input, shape index: {}]   ;;  %s4207_s2 = inlined_call_operand.hbm [shape: bf16[256,768], index: 2, kind: input, shape index: {}]   ;;  %s4208_s3 = inlined_call_operand.vmem [shape: f32[1,768], index: 3, kind: input, shape index: {}]   ;;  %s4209_s4 = inlined_call_operand.hbm [shape: bf16[256,256], index: 4, kind: input, shape index: {}]   ;;  %s4210_s5 = inlined_call_operand.vmem [shape: f32[1,256], index: 5, kind: input, shape index: {}]   ;;  %s4211_s6 = inlined_call_operand.vmem [shape: f32[1,256], index: 6, kind: input, shape index: {}]   ;;  %s4212_s7 = inlined_call_operand.vmem [shape: f32[1,256], index: 7, kind: input, shape index: {}]   ;;  %s4213_s8 = inlined_call_operand.hbm [shape: bf16[256,512], index: 8, kind: input, shape index: {}]   ;;  %s4214_s9 = inlined_call_operand.vmem [shape: f32[1,512], index: 9, kind: input, shape index: {}]   ;;  %s4215_s10 = inlined_call_operand.hbm [shape: bf16[512,256], index: 10, kind: input, shape index: {}]   ;;  %s4216_s11 = inlined_call_operand.vmem [shape: f32[1,256], index: 11, kind: input, shape index: {}]   ;;  %s4217_s12 = inlined_call_operand.vmem [shape: f32[1,256], index: 12, kind: input, shape index: {}]   ;;  %s4218_s13 = inlined_call_operand.vmem [shape: f32[1,256], index: 13, kind: input, shape index: {}]   ;;  %s4219_s14 = inlined_call_operand.hbm [shape: f32[2,8,256], index: 14, kind: output, shape index: {}]  }
   0x1   :  { %20 = vsyncpa [#allocation6], 0 }
   0x2   :  { %21 = vsyncpa [#allocation9], 0 }
   0x3   :  { %22 = vsyncpa [#allocation12], 0 }
   0x4   :  { %23 = vsyncpa [#allocation4], 0  ;;  %s3745_s29 = smov [#allocation5]   ;;  %s3581_s17 = scalar_lea.hbm %s4206_s1, 256 }
   0x5   :  { %s41_s30 = sshll.u32 %s3745_s29, 4  ;;  %p3582_p0 = scmp.ne.s32.totalorder %s4206_s1, %s3581_s17  ;;  %s42_s30 = int_to_ptr.vmem [resolvable:$true] %s41_s30 }
   0x6   :  { %p3585_p1 = scmp.lt.u32.totalorder %s3581_s17, %s4206_s1 }
   0x8   :  { %p3587_p2 = pnand %p3585_p1, %p3582_p0 }
   0xa   :  { %3590 = shalt.err (!%p3587_p2)
}
   0xb   :  { %s3591_s22 = scalar_lea.vmem %s42_s30, 256  ;;  %p3596_p4 = scmp.lt.s32.totalorder %s42_s30, %s42_s30 }
   0xc   :  { %p3592_p3 = scmp.ne.s32.totalorder %s42_s30, %s3591_s22  ;;  %p3597_p5 = scmp.lt.s32.totalorder %s3591_s22, %s3591_s22 }
   0xe   :  { %p3598_p6 = por %p3597_p5, %p3596_p4 }
  0x10   :  { %p3599_p7 = pnand %p3598_p6, %p3592_p3 }
  0x12   :  { %3602 = shalt.err (!%p3599_p7)
}
  0x13   :  { %s4220_s23 = smov 128   ;;  %s3747_s24 = smov 8  }
  0x14   :  { %47 = dma.hbm_to_vmem [thread:$0]  %s4206_s1, 256, %s42_s30, [#allocation6], %s4220_s23, %s4220_s23, %s3747_s24  }
  0x15   :  { %s3748_s27 = smov [#allocation8]   ;;  %s3749_s29 = smov [#allocation2]  }
  0x16   :  { %s67_s28 = sshll.u32 %s3748_s27, 4  ;;  %s29_s15 = sshll.u32 %s3749_s29, 4  ;;  %s68_s28 = int_to_ptr.vmem [resolvable:$true] %s67_s28  ;;  %s30_s15 = int_to_ptr.vmem [resolvable:$true] %s29_s15 }
  0x17   :  { %s3603_s18 = scalar_lea.hbm %s4209_s4, 4096 }
  0x18   :  { %p3604_p8 = scmp.ne.s32.totalorder %s4209_s4, %s3603_s18  ;;  %p3607_p9 = scmp.lt.u32.totalorder %s3603_s18, %s4209_s4 }
  0x1a   :  { %p3609_p10 = pnand %p3607_p9, %p3604_p8 }
  0x1c   :  { %3612 = shalt.err (!%p3609_p10)
}
  0x1d   :  { %s3613_s1 = scalar_lea.vmem %s68_s28, 4096  ;;  %p3618_p12 = scmp.lt.s32.totalorder %s68_s28, %s68_s28 }
  0x1e   :  { %p3614_p11 = scmp.ne.s32.totalorder %s68_s28, %s3613_s1  ;;  %p3619_p13 = scmp.lt.s32.totalorder %s3613_s1, %s3613_s1 }
  0x20   :  { %p3620_p0 = por %p3619_p13, %p3618_p12 }
  0x22   :  { %p3621_p1 = pnand %p3620_p0, %p3614_p11 }
  0x24   :  { %3624 = shalt.err (!%p3621_p1)
}
  0x25   :  { %73 = dma.hbm_to_vmem [thread:$0]  %s4209_s4, 4096, %s68_s28, [#allocation9], %s4220_s23, %s4220_s23, %s3747_s24  }
  0x26   :  { %s3625_s29 = scalar_lea.hbm %s4205_s0, 512 }
  0x27   :  { %p3626_p2 = scmp.ne.s32.totalorder %s4205_s0, %s3625_s29  ;;  %p3629_p3 = scmp.lt.u32.totalorder %s3625_s29, %s4205_s0 }
  0x29   :  { %p3631_p4 = pnand %p3629_p3, %p3626_p2 }
  0x2b   :  { %3634 = shalt.err (!%p3631_p4)
}
  0x2c   :  { %s3635_s20 = scalar_lea.vmem %s30_s15, 512  ;;  %p3640_p6 = scmp.lt.s32.totalorder %s30_s15, %s30_s15 }
  0x2d   :  { %p3636_p5 = scmp.ne.s32.totalorder %s30_s15, %s3635_s20  ;;  %p3641_p7 = scmp.lt.s32.totalorder %s3635_s20, %s3635_s20 }
  0x2f   :  { %p3642_p8 = por %p3641_p7, %p3640_p6 }
  0x31   :  { %p3643_p9 = pnand %p3642_p8, %p3636_p5 }
  0x33   :  { %3646 = shalt.err (!%p3643_p9)
}
  0x34   :  { %s3750_s4 = smov 256   ;;  %s3751_s28 = smov 16  }
  0x35   :  { %35 = dma.hbm_to_vmem [thread:$0]  %s4205_s0, 512, %s30_s15, [#allocation3], %s3750_s4, %s3750_s4, %s3751_s28  }
  0x36   :  { %s3752_s1 = smov [#allocation7]   ;;  %s3647_s27 = scalar_lea.hbm %s4207_s2, 12288 }
  0x37   :  { %s53_s30 = sshll.u32 %s3752_s1, 4  ;;  %p3648_p10 = scmp.ne.s32.totalorder %s4207_s2, %s3647_s27  ;;  %s54_s30 = int_to_ptr.vmem [resolvable:$true] %s53_s30 }
  0x38   :  { %p3651_p11 = scmp.lt.u32.totalorder %s3647_s27, %s4207_s2 }
  0x3a   :  { %p3653_p12 = pnand %p3651_p11, %p3648_p10 }
  0x3c   :  { %3656 = shalt.err (!%p3653_p12)
}
  0x3d   :  { %s3657_s19 = scalar_lea.vmem %s54_s30, 12288  ;;  %p3662_p0 = scmp.lt.s32.totalorder %s54_s30, %s54_s30 }
  0x3e   :  { %p3658_p13 = scmp.ne.s32.totalorder %s54_s30, %s3657_s19  ;;  %p3663_p1 = scmp.lt.s32.totalorder %s3657_s19, %s3657_s19 }
  0x40   :  { %p3664_p2 = por %p3663_p1, %p3662_p0 }
  0x42   :  { %p3665_p3 = pnand %p3664_p2, %p3658_p13 }
  0x44   :  { %3668 = shalt.err (!%p3665_p3)
}
  0x45   :  { %s3753_s0 = smov 384   ;;  %s3754_s15 = smov 24  }
  0x46   :  { %59 = dma.hbm_to_vmem [thread:$0]  %s4207_s2, 12288, %s54_s30, [#allocation6], %s3753_s0, %s3753_s0, %s3754_s15  }
  0x47   :  { %s3755_s22 = smov [#allocation10]   ;;  %s3756_s25 = smov [#allocation11]  }
  0x48   :  { %s85_s1 = sshll.u32 %s3755_s22, 4  ;;  %s99_s26 = sshll.u32 %s3756_s25, 4  ;;  %s86_s1 = int_to_ptr.vmem [resolvable:$true] %s85_s1  ;;  %s3893_s26 = int_to_ptr.vmem [resolvable:$true] %s99_s26 }
  0x49   :  { %s3669_s16 = scalar_lea.hbm %s4213_s8, 8192 }
  0x4a   :  { %p3670_p4 = scmp.ne.s32.totalorder %s4213_s8, %s3669_s16  ;;  %p3673_p5 = scmp.lt.u32.totalorder %s3669_s16, %s4213_s8 }
  0x4c   :  { %p3675_p6 = pnand %p3673_p5, %p3670_p4 }
  0x4e   :  { %3678 = shalt.err (!%p3675_p6)
}
  0x4f   :  { %s3679_s2 = scalar_lea.vmem %s86_s1, 8192  ;;  %p3684_p8 = scmp.lt.s32.totalorder %s86_s1, %s86_s1 }
  0x50   :  { %p3680_p7 = scmp.ne.s32.totalorder %s86_s1, %s3679_s2  ;;  %p3685_p9 = scmp.lt.s32.totalorder %s3679_s2, %s3679_s2 }
  0x52   :  { %p3686_p10 = por %p3685_p9, %p3684_p8 }
  0x54   :  { %p3687_p11 = pnand %p3686_p10, %p3680_p7 }
  0x56   :  { %3690 = shalt.err (!%p3687_p11)
}
  0x57   :  { %91 = dma.hbm_to_vmem [thread:$0]  %s4213_s8, 8192, %s86_s1, [#allocation9], %s3750_s4, %s3750_s4, %s3751_s28  }
  0x58   :  { %s3691_s23 = scalar_lea.hbm %s4215_s10, 8192 }
  0x59   :  { %p3692_p12 = scmp.ne.s32.totalorder %s4215_s10, %s3691_s23  ;;  %p3695_p13 = scmp.lt.u32.totalorder %s3691_s23, %s4215_s10 }
  0x5b   :  { %p3697_p0 = pnand %p3695_p13, %p3692_p12 }
  0x5d   :  { %3700 = shalt.err (!%p3697_p0)
}
  0x5e   :  { %s3701_s29 = scalar_lea.vmem %s3893_s26, 8192  ;;  %p3706_p2 = scmp.lt.s32.totalorder %s3893_s26, %s3893_s26 }
  0x5f   :  { %p3702_p1 = scmp.ne.s32.totalorder %s3893_s26, %s3701_s29  ;;  %p3707_p3 = scmp.lt.s32.totalorder %s3701_s29, %s3701_s29 }
  0x61   :  { %p3708_p4 = por %p3707_p3, %p3706_p2 }
  0x63   :  { %p3709_p5 = pnand %p3708_p4, %p3702_p1 }
  0x65   :  { %3712 = shalt.err (!%p3709_p5)
}
  0x66   :  { %s4221_s8 = smov 128  }
  0x67   :  { %105 = dma.hbm_to_vmem [thread:$0]  %s4215_s10, 8192, %s3893_s26, [#allocation12], %s4221_s8, %s4221_s8, %s3747_s24  }
  0x68   :  { %3735 = dma.done.wait [#allocation3], 512  }
  0x69   :  { %3736 = vsyncadd [#allocation3], 4294966784 }
  0x6a   :  { %3737 = dma.done.wait [#allocation6], 12544  }
  0x6b   :  { %3738 = vsyncadd [#allocation6], 4294954752 }
  0x6c   :  { %3739 = dma.done.wait [#allocation9], 12288  }
  0x6d   :  { %3740 = vsyncadd [#allocation9], 4294955008 }
  0x6e   :  { %3741 = dma.done.wait [#allocation12], 8192  }
  0x6f   :  { %3742 = vsyncadd [#allocation12], 4294959104  ;;  %v3169_v0 = vld [vmem:[#allocation7 + $0x4] ss:$24 sps:$4 sm:$0xff]   ;;  %v3171_v1 = vld [vmem:[#allocation7] ss:$24 sps:$4 sm:$0xff]  }
  0x70   :  { %745 = vmatprep.subr.bf16.mxu1 %v3169_v0  ;;  %v3172_v2 = vld [vmem:[#allocation7 + $0x34] ss:$24 sps:$4 sm:$0xff]   ;;  %v3174_v3 = vld [vmem:[#allocation7 + $0x30] ss:$24 sps:$4 sm:$0xff]   ;;  %v3175_v4 = vld [vmem:[#allocation7 + $0x64] ss:$24 sps:$4 sm:$0xff]  }
  0x71   :  { %746 = vmatpush1.bf16.msra.mxu1 %v3171_v1  ;;  %v3177_v5 = vld [vmem:[#allocation7 + $0x60] ss:$24 sps:$4 sm:$0xff]   ;;  %v3178_v6 = vld [vmem:[#allocation7 + $0x94] ss:$24 sps:$4 sm:$0xff]   ;;  %v3180_v7 = vld [vmem:[#allocation7 + $0x90] ss:$24 sps:$4 sm:$0xff]  }
  0x72   :  { %747 = vmatprep.subr.bf16.mxu1 %v3172_v2  ;;  %v3181_v8 = vld [vmem:[#allocation7 + $0xc4] ss:$24 sps:$4 sm:$0xff]   ;;  %v3183_v9 = vld [vmem:[#allocation7 + $0xc0] ss:$24 sps:$4 sm:$0xff]   ;;  %v3184_v10 = vld [vmem:[#allocation7 + $0xf4] ss:$24 sps:$4 sm:$0xff]  }
  0x73   :  { %v3186_v11 = vld [vmem:[#allocation7 + $0xf0] ss:$24 sps:$4 sm:$0xff]   ;;  %v3187_v12 = vld [vmem:[#allocation7 + $0x124] ss:$24 sps:$4 sm:$0xff]   ;;  %v3189_v16 = vld [vmem:[#allocation7 + $0x120] ss:$24 sps:$4 sm:$0xff]  }
  0x74   :  { %v132_v13 = vld [vmem:[#allocation2 + $0x8] sm:$0xff]  ;;  %v134_v14 = vld [vmem:[#allocation2 + $0x18] sm:$0xff]  ;;  %v131_v35 = vld [vmem:[#allocation2] sm:$0xff]  ;;  %vm3758_vm0 = vmmov 0   ;;  %vm924_vm2 = vcmask 64512   ;;  %vm940_vm3 = vcmask 1043456  }
  0x75   :  { %748 = vmatpush1.bf16.msra.mxu1 %v3174_v3  ;;  %v136_v15 = vpack.c.bf16 %v134_v14, %v132_v13  ;;  %v3190_v17 = vld [vmem:[#allocation7 + $0x154] ss:$24 sps:$4 sm:$0xff]   ;;  %v3192_v18 = vld [vmem:[#allocation7 + $0x150] ss:$24 sps:$4 sm:$0xff]   ;;  %v3193_v19 = vld [vmem:[#allocation7 + $0x184] ss:$24 sps:$4 sm:$0xff]  }
  0x76   :  { %749 = vmatprep.subr.bf16.mxu1 %v3175_v4  ;;  %v3195_v20 = vld [vmem:[#allocation7 + $0x180] ss:$24 sps:$4 sm:$0xff]   ;;  %v3196_v21 = vld [vmem:[#allocation7 + $0x1b4] ss:$24 sps:$4 sm:$0xff]   ;;  %v3198_v22 = vld [vmem:[#allocation7 + $0x1b0] ss:$24 sps:$4 sm:$0xff]  }
  0x77   :  { %777 = vmatprep.mubr.bf16.mxu1 %v136_v15  ;;  %863 = vmatprep.mubr.bf16.mxu0 %v136_v15  ;;  %v3199_v23 = vld [vmem:[#allocation7 + $0x1e4] ss:$24 sps:$4 sm:$0xff]   ;;  %v3201_v24 = vld [vmem:[#allocation7 + $0x1e0] ss:$24 sps:$4 sm:$0xff]   ;;  %v3202_v25 = vld [vmem:[#allocation7 + $0x214] ss:$24 sps:$4 sm:$0xff]  }
  0x78   :  { %v3204_v26 = vld [vmem:[#allocation7 + $0x210] ss:$24 sps:$4 sm:$0xff]   ;;  %v3205_v27 = vld [vmem:[#allocation7 + $0x244] ss:$24 sps:$4 sm:$0xff]   ;;  %v3207_v28 = vld [vmem:[#allocation7 + $0x240] ss:$24 sps:$4 sm:$0xff]  }
  0x79   :  { %750 = vmatpush1.bf16.msra.mxu1 %v3177_v5  ;;  %v3208_v29 = vld [vmem:[#allocation7 + $0x274] ss:$24 sps:$4 sm:$0xff]   ;;  %v3210_v30 = vld [vmem:[#allocation7 + $0x270] ss:$24 sps:$4 sm:$0xff]   ;;  %v3211_v31 = vld [vmem:[#allocation7 + $0x2a4] ss:$24 sps:$4 sm:$0xff]  }
  0x7a   :  { %751 = vmatprep.subr.bf16.mxu1 %v3178_v6  ;;  %v3213_v32 = vld [vmem:[#allocation7 + $0x2a0] ss:$24 sps:$4 sm:$0xff]   ;;  %v3214_v33 = vld [vmem:[#allocation7 + $0x2d4] ss:$24 sps:$4 sm:$0xff]   ;;  %v3216_v34 = vld [vmem:[#allocation7 + $0x2d0] ss:$24 sps:$4 sm:$0xff]  }
  0x7b   :  { %v133_v36 = vld [vmem:[#allocation2 + $0x10] sm:$0xff]  ;;  %v3222_v40 = vld [vmem:[#allocation7 + $0x3c] ss:$24 sps:$4 sm:$0xff]   ;;  %v3220_v41 = vld [vmem:[#allocation7 + $0x38] ss:$24 sps:$4 sm:$0xff]   ;;  %v3757_v6 = vmov 0.0  }
  0x7c   :  { %v3219_v37 = vld [vmem:[#allocation7 + $0xc] ss:$24 sps:$4 sm:$0xff]   ;;  %v3217_v38 = vld [vmem:[#allocation7 + $0x8] ss:$24 sps:$4 sm:$0xff]   ;;  %v3930_v39 = vpack.c.bf16 %v133_v36, %v131_v35  ;;  %v3228_v44 = vld [vmem:[#allocation7 + $0x9c] ss:$24 sps:$4 sm:$0xff]  }
  0x7d   :  { %752 = vmatpush1.bf16.msra.mxu1 %v3180_v7  ;;  %v3225_v42 = vld [vmem:[#allocation7 + $0x6c] ss:$24 sps:$4 sm:$0xff]   ;;  %v3223_v43 = vld [vmem:[#allocation7 + $0x68] ss:$24 sps:$4 sm:$0xff]   ;;  %v3226_v45 = vld [vmem:[#allocation7 + $0x98] ss:$24 sps:$4 sm:$0xff]   ;;  %v235_v7 = vlaneseq }
  0x7e   :  { %753 = vmatprep.subr.bf16.mxu1 %v3181_v8  ;;  %v3231_v46 = vld [vmem:[#allocation7 + $0xcc] ss:$24 sps:$4 sm:$0xff]   ;;  %v3229_v47 = vld [vmem:[#allocation7 + $0xc8] ss:$24 sps:$4 sm:$0xff]   ;;  %v3234_v48 = vld [vmem:[#allocation7 + $0xfc] ss:$24 sps:$4 sm:$0xff]  }
  0x7f   :  { %v3232_v49 = vld [vmem:[#allocation7 + $0xf8] ss:$24 sps:$4 sm:$0xff]   ;;  %v3237_v50 = vld [vmem:[#allocation7 + $0x12c] ss:$24 sps:$4 sm:$0xff]   ;;  %v3235_v51 = vld [vmem:[#allocation7 + $0x128] ss:$24 sps:$4 sm:$0xff]  }
  0x80   :  { %v3240_v52 = vld [vmem:[#allocation7 + $0x15c] ss:$24 sps:$4 sm:$0xff]   ;;  %v3238_v53 = vld [vmem:[#allocation7 + $0x158] ss:$24 sps:$4 sm:$0xff]   ;;  %v3243_v54 = vld [vmem:[#allocation7 + $0x18c] ss:$24 sps:$4 sm:$0xff]  }
  0x81   :  { %754 = vmatpush1.bf16.msra.mxu1 %v3183_v9  ;;  %v3241_v55 = vld [vmem:[#allocation7 + $0x188] ss:$24 sps:$4 sm:$0xff]   ;;  %v3246_v56 = vld [vmem:[#allocation7 + $0x1bc] ss:$24 sps:$4 sm:$0xff]   ;;  %v3244_v57 = vld [vmem:[#allocation7 + $0x1b8] ss:$24 sps:$4 sm:$0xff]  }
  0x82   :  { %755 = vmatprep.subr.bf16.mxu1 %v3184_v10  ;;  %v3249_v58 = vld [vmem:[#allocation7 + $0x1ec] ss:$24 sps:$4 sm:$0xff]   ;;  %v3247_v59 = vld [vmem:[#allocation7 + $0x1e8] ss:$24 sps:$4 sm:$0xff]   ;;  %v3252_v60 = vld [vmem:[#allocation7 + $0x21c] ss:$24 sps:$4 sm:$0xff]  }
  0x83   :  { %v3250_v61 = vld [vmem:[#allocation7 + $0x218] ss:$24 sps:$4 sm:$0xff]   ;;  %v3255_v62 = vld [vmem:[#allocation7 + $0x24c] ss:$24 sps:$4 sm:$0xff]   ;;  %v3253_v63 = vld [vmem:[#allocation7 + $0x248] ss:$24 sps:$4 sm:$0xff]  }
  0x84   :  { %v3258_v0 = vld [vmem:[#allocation7 + $0x27c] ss:$24 sps:$4 sm:$0xff]   ;;  %v3256_v1 = vld [vmem:[#allocation7 + $0x278] ss:$24 sps:$4 sm:$0xff]   ;;  %v3261_v2 = vld [vmem:[#allocation7 + $0x2ac] ss:$24 sps:$4 sm:$0xff]  }
  0x85   :  { %756 = vmatpush1.bf16.msra.mxu1 %v3186_v11  ;;  %v3259_v3 = vld [vmem:[#allocation7 + $0x2a8] ss:$24 sps:$4 sm:$0xff]   ;;  %v3264_v4 = vld [vmem:[#allocation7 + $0x2dc] ss:$24 sps:$4 sm:$0xff]   ;;  %v3262_v5 = vld [vmem:[#allocation7 + $0x2d8] ss:$24 sps:$4 sm:$0xff]  }
  0x86   :  { %757 = vmatprep.subr.bf16.mxu1 %v3187_v12  ;;  %v3937_v8 = vshrl.u32 %v235_v7, 7  ;;  %v3945_v10 = vld [vmem:[%s4208_s3] sm:$0x3f]  ;;  %v3312_v7 = vld [vmem:[#allocation7 + $0x2e0] ss:$24 sps:$4 sm:$0xff]  }
  0x88   :  { %v3940_v9 = vsub.s32 0, %v3937_v8  ;;  %v3948_v11 = vsub.s32 1, %v3937_v8 }
  0x89   :  { %758 = vmatpush1.bf16.msra.mxu1 %v3189_v16 }
  0x8a   :  { %759 = vmatprep.subr.bf16.mxu1 %v3190_v17  ;;  %v238_v12 = vrot.slane %v3945_v10, %v3940_v9  ;;  %v242_v14 = vrot.slane %v3945_v10, %v3948_v11 }
  0x8d   :  { %760 = vmatpush1.bf16.msra.mxu1 %v3192_v18 }
  0x8e   :  { %761 = vmatprep.subr.bf16.mxu1 %v3193_v19 }
  0x91   :  { %762 = vmatpush1.bf16.msra.mxu1 %v3195_v20 }
  0x92   :  { %763 = vmatprep.subr.bf16.mxu1 %v3196_v21 }
  0x95   :  { %764 = vmatpush1.bf16.msra.mxu1 %v3198_v22 }
  0x96   :  { %765 = vmatprep.subr.bf16.mxu1 %v3199_v23 }
  0x99   :  { %766 = vmatpush1.bf16.msra.mxu1 %v3201_v24  ;;  %v245_v24 = vsub.s32 2, %v3937_v8 }
  0x9a   :  { %767 = vmatprep.subr.bf16.mxu1 %v3202_v25  ;;  %v249_v25 = vsub.s32 3, %v3937_v8 }
  0x9d   :  { %768 = vmatpush1.bf16.msra.mxu1 %v3204_v26  ;;  %v246_v26 = vrot.slane %v3945_v10, %v245_v24 }
  0x9e   :  { %769 = vmatprep.subr.bf16.mxu1 %v3205_v27 }
  0xa1   :  { %770 = vmatpush1.bf16.msra.mxu1 %v3207_v28  ;;  %v250_v28 = vrot.slane %v3945_v10, %v249_v25 }
  0xa2   :  { %771 = vmatprep.subr.bf16.mxu1 %v3208_v29 }
  0xa5   :  { %772 = vmatpush1.bf16.msra.mxu1 %v3210_v30 }
  0xa6   :  { %773 = vmatprep.subr.bf16.mxu1 %v3211_v31 }
  0xa9   :  { %774 = vmatpush1.bf16.msra.mxu1 %v3213_v32 }
  0xaa   :  { %775 = vmatprep.subr.bf16.mxu1 %v3214_v33 }
  0xad   :  { %776 = vmatpush1.bf16.msra.mxu1 %v3216_v34 }
  0xae   :  { %788 = vmatprep.subr.bf16.mxu1 %v3219_v37 }
  0xb0   :  { %778 = vmatmul.mubr.bf16.vlgmr.msra.gmra.mrb[0].mxu1 %v3930_v39 }
  0xb1   :  { %789 = vmatpush1.bf16.msra.mxu1 %v3217_v38  ;;  %820 = vmatprep.mubr.bf16.mxu1 %v136_v15  ;;  %v3265_v38 = vld [vmem:[#allocation7 + $0x14] ss:$24 sps:$4 sm:$0xff]  }
  0xb2   :  { %790 = vmatprep.subr.bf16.mxu1 %v3222_v40  ;;  %v3267_v40 = vld [vmem:[#allocation7 + $0x10] ss:$24 sps:$4 sm:$0xff]   ;;  %831 = vmatprep.subr.bf16.mxu0 %v3265_v38 }
  0xb3   :  { %832 = vmatpush1.bf16.msra.mxu0 %v3267_v40 }
  0xb5   :  { %791 = vmatpush1.bf16.msra.mxu1 %v3220_v41  ;;  %v3268_v41 = vld [vmem:[#allocation7 + $0x44] ss:$24 sps:$4 sm:$0xff]  }
  0xb6   :  { %792 = vmatprep.subr.bf16.mxu1 %v3225_v42  ;;  %v3270_v42 = vld [vmem:[#allocation7 + $0x40] ss:$24 sps:$4 sm:$0xff]   ;;  %833 = vmatprep.subr.bf16.mxu0 %v3268_v41 }
  0xb7   :  { %834 = vmatpush1.bf16.msra.mxu0 %v3270_v42 }
  0xb9   :  { %793 = vmatpush1.bf16.msra.mxu1 %v3223_v43  ;;  %v3271_v43 = vld [vmem:[#allocation7 + $0x74] ss:$24 sps:$4 sm:$0xff]  }
  0xba   :  { %794 = vmatprep.subr.bf16.mxu1 %v3228_v44  ;;  %v3273_v44 = vld [vmem:[#allocation7 + $0x70] ss:$24 sps:$4 sm:$0xff]   ;;  %835 = vmatprep.subr.bf16.mxu0 %v3271_v43 }
  0xbb   :  { %836 = vmatpush1.bf16.msra.mxu0 %v3273_v44 }
  0xbd   :  { %795 = vmatpush1.bf16.msra.mxu1 %v3226_v45  ;;  %v3274_v45 = vld [vmem:[#allocation7 + $0xa4] ss:$24 sps:$4 sm:$0xff]  }
  0xbe   :  { %796 = vmatprep.subr.bf16.mxu1 %v3231_v46  ;;  %v3276_v46 = vld [vmem:[#allocation7 + $0xa0] ss:$24 sps:$4 sm:$0xff]   ;;  %837 = vmatprep.subr.bf16.mxu0 %v3274_v45 }
  0xbf   :  { %838 = vmatpush1.bf16.msra.mxu0 %v3276_v46 }
  0xc1   :  { %797 = vmatpush1.bf16.msra.mxu1 %v3229_v47  ;;  %v3277_v47 = vld [vmem:[#allocation7 + $0xd4] ss:$24 sps:$4 sm:$0xff]  }
  0xc2   :  { %798 = vmatprep.subr.bf16.mxu1 %v3234_v48  ;;  %v3279_v48 = vld [vmem:[#allocation7 + $0xd0] ss:$24 sps:$4 sm:$0xff]   ;;  %839 = vmatprep.subr.bf16.mxu0 %v3277_v47 }
  0xc3   :  { %840 = vmatpush1.bf16.msra.mxu0 %v3279_v48 }
  0xc5   :  { %799 = vmatpush1.bf16.msra.mxu1 %v3232_v49  ;;  %v3280_v49 = vld [vmem:[#allocation7 + $0x104] ss:$24 sps:$4 sm:$0xff]  }
  0xc6   :  { %800 = vmatprep.subr.bf16.mxu1 %v3237_v50  ;;  %v3282_v50 = vld [vmem:[#allocation7 + $0x100] ss:$24 sps:$4 sm:$0xff]   ;;  %841 = vmatprep.subr.bf16.mxu0 %v3280_v49 }
  0xc7   :  { %842 = vmatpush1.bf16.msra.mxu0 %v3282_v50  ;;  %v3991_v50 = vld [vmem:[#allocation8] ss:$8 sps:$4 sm:$0xff]  }
  0xc9   :  { %801 = vmatpush1.bf16.msra.mxu1 %v3235_v51  ;;  %v3283_v51 = vld [vmem:[#allocation7 + $0x134] ss:$24 sps:$4 sm:$0xff]  }
  0xca   :  { %802 = vmatprep.subr.bf16.mxu1 %v3240_v52  ;;  %v3285_v52 = vld [vmem:[#allocation7 + $0x130] ss:$24 sps:$4 sm:$0xff]   ;;  %843 = vmatprep.subr.bf16.mxu0 %v3283_v51  ;;  %v3993_v51 = vld [vmem:[#allocation8 + $0x4] ss:$8 sps:$4 sm:$0xff]  }
  0xcb   :  { %844 = vmatpush1.bf16.msra.mxu0 %v3285_v52  ;;  %v3995_v52 = vld [vmem:[#allocation8 + $0x14] ss:$8 sps:$4 sm:$0xff]  }
  0xcd   :  { %803 = vmatpush1.bf16.msra.mxu1 %v3238_v53  ;;  %v3286_v53 = vld [vmem:[#allocation7 + $0x164] ss:$24 sps:$4 sm:$0xff]  }
  0xce   :  { %804 = vmatprep.subr.bf16.mxu1 %v3243_v54  ;;  %v3288_v54 = vld [vmem:[#allocation7 + $0x160] ss:$24 sps:$4 sm:$0xff]   ;;  %845 = vmatprep.subr.bf16.mxu0 %v3286_v53 }
  0xcf   :  { %846 = vmatpush1.bf16.msra.mxu0 %v3288_v54  ;;  %v3999_v53 = vld [vmem:[#allocation8 + $0x10] ss:$8 sps:$4 sm:$0xff]   ;;  %v4002_v54 = vld [vmem:[#allocation8 + $0x24] ss:$8 sps:$4 sm:$0xff]  }
  0xd1   :  { %805 = vmatpush1.bf16.msra.mxu1 %v3241_v55  ;;  %v3289_v55 = vld [vmem:[#allocation7 + $0x194] ss:$24 sps:$4 sm:$0xff]  }
  0xd2   :  { %806 = vmatprep.subr.bf16.mxu1 %v3246_v56  ;;  %v3291_v56 = vld [vmem:[#allocation7 + $0x190] ss:$24 sps:$4 sm:$0xff]   ;;  %847 = vmatprep.subr.bf16.mxu0 %v3289_v55 }
  0xd3   :  { %848 = vmatpush1.bf16.msra.mxu0 %v3291_v56  ;;  %v4005_v55 = vld [vmem:[#allocation8 + $0x20] ss:$8 sps:$4 sm:$0xff]   ;;  %v4008_v56 = vld [vmem:[#allocation8 + $0x34] ss:$8 sps:$4 sm:$0xff]  }
  0xd5   :  { %807 = vmatpush1.bf16.msra.mxu1 %v3244_v57  ;;  %v3292_v57 = vld [vmem:[#allocation7 + $0x1c4] ss:$24 sps:$4 sm:$0xff]  }
  0xd6   :  { %808 = vmatprep.subr.bf16.mxu1 %v3249_v58  ;;  %v3294_v58 = vld [vmem:[#allocation7 + $0x1c0] ss:$24 sps:$4 sm:$0xff]   ;;  %849 = vmatprep.subr.bf16.mxu0 %v3292_v57 }
  0xd7   :  { %850 = vmatpush1.bf16.msra.mxu0 %v3294_v58  ;;  %v4011_v57 = vld [vmem:[#allocation8 + $0x30] ss:$8 sps:$4 sm:$0xff]   ;;  %v4014_v58 = vld [vmem:[#allocation8 + $0x44] ss:$8 sps:$4 sm:$0xff]  }
  0xd9   :  { %809 = vmatpush1.bf16.msra.mxu1 %v3247_v59  ;;  %v3295_v59 = vld [vmem:[#allocation7 + $0x1f4] ss:$24 sps:$4 sm:$0xff]  }
  0xda   :  { %810 = vmatprep.subr.bf16.mxu1 %v3252_v60  ;;  %v3297_v60 = vld [vmem:[#allocation7 + $0x1f0] ss:$24 sps:$4 sm:$0xff]   ;;  %851 = vmatprep.subr.bf16.mxu0 %v3295_v59 }
  0xdb   :  { %852 = vmatpush1.bf16.msra.mxu0 %v3297_v60  ;;  %v4017_v59 = vld [vmem:[#allocation8 + $0x40] ss:$8 sps:$4 sm:$0xff]   ;;  %v4020_v60 = vld [vmem:[#allocation8 + $0x54] ss:$8 sps:$4 sm:$0xff]  }
  0xdd   :  { %811 = vmatpush1.bf16.msra.mxu1 %v3250_v61  ;;  %v3298_v61 = vld [vmem:[#allocation7 + $0x224] ss:$24 sps:$4 sm:$0xff]  }
  0xde   :  { %812 = vmatprep.subr.bf16.mxu1 %v3255_v62  ;;  %v3300_v62 = vld [vmem:[#allocation7 + $0x220] ss:$24 sps:$4 sm:$0xff]   ;;  %853 = vmatprep.subr.bf16.mxu0 %v3298_v61 }
  0xdf   :  { %854 = vmatpush1.bf16.msra.mxu0 %v3300_v62  ;;  %v4023_v61 = vld [vmem:[#allocation8 + $0x50] ss:$8 sps:$4 sm:$0xff]   ;;  %v4026_v62 = vld [vmem:[#allocation8 + $0x64] ss:$8 sps:$4 sm:$0xff]  }
  0xe1   :  { %813 = vmatpush1.bf16.msra.mxu1 %v3253_v63  ;;  %v3301_v63 = vld [vmem:[#allocation7 + $0x254] ss:$24 sps:$4 sm:$0xff]  }
  0xe2   :  { %814 = vmatprep.subr.bf16.mxu1 %v3258_v0  ;;  %v3303_v0 = vld [vmem:[#allocation7 + $0x250] ss:$24 sps:$4 sm:$0xff]   ;;  %855 = vmatprep.subr.bf16.mxu0 %v3301_v63 }
  0xe3   :  { %856 = vmatpush1.bf16.msra.mxu0 %v3303_v0  ;;  %v4029_v63 = vld [vmem:[#allocation8 + $0x60] ss:$8 sps:$4 sm:$0xff]   ;;  %v4032_v0 = vld [vmem:[#allocation8 + $0x74] ss:$8 sps:$4 sm:$0xff]  }
  0xe5   :  { %815 = vmatpush1.bf16.msra.mxu1 %v3256_v1  ;;  %v3304_v1 = vld [vmem:[#allocation7 + $0x284] ss:$24 sps:$4 sm:$0xff]  }
  0xe6   :  { %816 = vmatprep.subr.bf16.mxu1 %v3261_v2  ;;  %v3306_v2 = vld [vmem:[#allocation7 + $0x280] ss:$24 sps:$4 sm:$0xff]   ;;  %857 = vmatprep.subr.bf16.mxu0 %v3304_v1 }
  0xe7   :  { %858 = vmatpush1.bf16.msra.mxu0 %v3306_v2  ;;  %v4035_v1 = vld [vmem:[#allocation8 + $0x70] ss:$8 sps:$4 sm:$0xff]  }
  0xe9   :  { %817 = vmatpush1.bf16.msra.mxu1 %v3259_v3  ;;  %v3307_v3 = vld [vmem:[#allocation7 + $0x2b4] ss:$24 sps:$4 sm:$0xff]  }
  0xea   :  { %818 = vmatprep.subr.bf16.mxu1 %v3264_v4  ;;  %v3309_v4 = vld [vmem:[#allocation7 + $0x2b0] ss:$24 sps:$4 sm:$0xff]   ;;  %859 = vmatprep.subr.bf16.mxu0 %v3307_v3 }
  0xeb   :  { %860 = vmatpush1.bf16.msra.mxu0 %v3309_v4 }
  0xed   :  { %819 = vmatpush1.bf16.msra.mxu1 %v3262_v5  ;;  %v3310_v5 = vld [vmem:[#allocation7 + $0x2e4] ss:$24 sps:$4 sm:$0xff]  }
  0xee   :  { %3097 = vmatprep.subr.bf16.mxu1 %v3757_v6  ;;  %861 = vmatprep.subr.bf16.mxu0 %v3310_v5 }
  0xef   :  { %862 = vmatpush1.bf16.msra.mxu0 %v3312_v7  ;;  %v3759_v7 = vmov 0  }
  0xf0   :  { %821 = vmatmul.mubr.bf16.vlgmr.msra.gmra.mrb[4].mxu1 %v3930_v39  ;;  %1317 = vmatprep.subr.bf16.mxu0 %v3993_v51 }
  0xf1   :  { %3099 = vmatprep.mubr.msk.bf16.mxu1 %vm3758_vm0, %v3757_v6 }
  0xf2   :  { %864 = vmatmul.mubr.bf16.vlgmr.msra.gmra.mrb[0].mxu0 %v3930_v39  ;;  %v257_v39 = vsub.s32 5, %v3937_v8 }
  0xf3   :  { %1318 = vmatpush1.bf16.msra.mxu0 %v3991_v50  ;;  %1349 = vmatprep.mubr.bf16.mxu0 %v3759_v7 }
  0xf4   :  { %1319 = vmatprep.subr.bf16.mxu0 %v3995_v52 }
  0xf7   :  { %1320 = vmatpush1.bf16.msra.mxu0 %v3999_v53 }
  0xf8   :  { %1321 = vmatprep.subr.bf16.mxu0 %v4002_v54 }
  0xfb   :  { %1322 = vmatpush1.bf16.msra.mxu0 %v4005_v55 }
  0xfc   :  { %1323 = vmatprep.subr.bf16.mxu0 %v4008_v56 }
  0xff   :  { %1324 = vmatpush1.bf16.msra.mxu0 %v4011_v57 }
 0x100   :  { %1325 = vmatprep.subr.bf16.mxu0 %v4014_v58 }
 0x103   :  { %1326 = vmatpush1.bf16.msra.mxu0 %v4017_v59 }
 0x104   :  { %1327 = vmatprep.subr.bf16.mxu0 %v4020_v60 }
 0x107   :  { %1328 = vmatpush1.bf16.msra.mxu0 %v4023_v61 }
 0x108   :  { %1329 = vmatprep.subr.bf16.mxu0 %v4026_v62 }
 0x10b   :  { %1330 = vmatpush1.bf16.msra.mxu0 %v4029_v63 }
 0x10c   :  { %1331 = vmatprep.subr.bf16.mxu0 %v4032_v0 }
 0x10f   :  { %1332 = vmatpush1.bf16.msra.mxu0 %v4035_v1 }
 0x183   :  { %v779_v13 = vpop.f32.mrb[0].mxu1 }
 0x184   :  { %v780_v15 = vadd.f32 %v779_v13, %v238_v12  ;;  %v781_v16 = vpop.f32.mrb[1].mxu1 }
 0x185   :  { %v783_v17 = vpop.f32.mrb[2].mxu1  ;;  %v782_v20 = vadd.f32 %v781_v16, %v242_v14 }
 0x186   :  { %v784_v18 = vadd.f32 %v783_v17, %v238_v12  ;;  %v785_v19 = vpop.f32.mrb[3].mxu1  ;;  %v880_v12 = vld [vmem:[#allocation5] sm:$0xff] }
 0x187   :  { %v786_v21 = vadd.f32 %v785_v19, %v242_v14  ;;  %vm882_vm1 = vcmp.gt.f32.partialorder %v880_v12, 0.5 }
 0x188   :  { %v3954_v22 = vpack.c.bf16 %v784_v18, %v780_v15  ;;  %v3977_v13 = vsel %vm882_vm1, -10000.0, %v3757_v6 }
 0x189   :  { %v3956_v23 = vpack.c.bf16 %v786_v21, %v782_v20 }
 0x1c3   :  { %v822_v27 = vpop.f32.mrb[4].mxu1 }
 0x1c4   :  { %v824_v29 = vpop.f32.mrb[5].mxu1  ;;  %v823_v31 = vadd.f32 %v822_v27, %v246_v26 }
 0x1c5   :  { %v826_v30 = vpop.f32.mrb[6].mxu1  ;;  %v825_v34 = vadd.f32 %v824_v29, %v250_v28  ;;  %v258_v29 = vrot.slane %v3945_v10, %v257_v39 }
 0x1c6   :  { %v827_v32 = vadd.f32 %v826_v30, %v246_v26  ;;  %v828_v33 = vpop.f32.mrb[7].mxu1  ;;  %v253_v26 = vsub.s32 4, %v3937_v8  ;;  %v865_v30 = vpop.f32.mrb[0].mxu0 }
 0x1c7   :  { %v829_v35 = vadd.f32 %v828_v33, %v250_v28 }
 0x1c8   :  { %v3966_v36 = vpack.c.bf16 %v827_v32, %v823_v31  ;;  %v254_v28 = vrot.slane %v3945_v10, %v253_v26  ;;  %v867_v32 = vpop.f32.mrb[1].mxu0 }
 0x1c9   :  { %v3968_v37 = vpack.c.bf16 %v829_v35, %v825_v34  ;;  %v868_v33 = vadd.f32 %v867_v32, %v258_v29  ;;  %v869_v34 = vpop.f32.mrb[2].mxu0  ;;  %v3339_v32 = vld [vmem:[#allocation8 + $0x84] ss:$8 sps:$4 sm:$0xff]  }
 0x1ca   :  { %3098 = vmatpush3.bf16.xpose.msra.mxu1 %v3966_v36  ;;  %v866_v31 = vadd.f32 %v865_v30, %v254_v28  ;;  %v870_v35 = vadd.f32 %v869_v34, %v254_v28  ;;  %v871_v38 = vpop.f32.mrb[3].mxu0  ;;  %v3342_v34 = vld [vmem:[#allocation8 + $0x94] ss:$8 sps:$4 sm:$0xff]   ;;  %1574 = vmatprep.subr.bf16.mxu0 %v3339_v32 }
 0x1cb   :  { %3103 = vmatprep.subr.bf16.mxu1 %v3757_v6  ;;  %v872_v40 = vadd.f32 %v871_v38, %v258_v29  ;;  %v3343_v38 = vld [vmem:[#allocation8 + $0xa0] ss:$8 sps:$4 sm:$0xff]  }
 0x1cc   :  { %v878_v41 = vpack.c.bf16 %v870_v35, %v866_v31  ;;  %v3345_v35 = vld [vmem:[#allocation8 + $0xa4] ss:$8 sps:$4 sm:$0xff]  }
 0x1cd   :  { %v879_v42 = vpack.c.bf16 %v872_v40, %v868_v33  ;;  %v3337_v33 = vld [vmem:[#allocation8 + $0x80] ss:$8 sps:$4 sm:$0xff]   ;;  %v3348_v40 = vld [vmem:[#allocation8 + $0xb4] ss:$8 sps:$4 sm:$0xff]  }
 0x1ce   :  { %v1419_v45 = vrot.slane %v878_v41, 4  ;;  %v942_v47 = vsel %vm940_vm3, %v878_v41, 0  ;;  %v3346_v41 = vld [vmem:[#allocation8 + $0xb0] ss:$8 sps:$4 sm:$0xff]  }
 0x1cf   :  { %v1526_v46 = vrot.slane %v879_v42, 4  ;;  %v1057_v10 = vsel %vm940_vm3, %v879_v42, 0  ;;  %v3351_v42 = vld [vmem:[#allocation8 + $0xc4] ss:$8 sps:$4 sm:$0xff]  }
 0x1d0   :  { %v3987_v48 = vsel %vm940_vm3, %v1419_v45, 0 }
 0x1d1   :  { %3100 = vmatmul.mubr.bf16.vlgmr.msra.gmra.mrb[8].mxu1 %v3954_v22  ;;  %v3989_v49 = vsel %vm940_vm3, %v1526_v46, 0  ;;  %v3349_v46 = vld [vmem:[#allocation8 + $0xc0] ss:$8 sps:$4 sm:$0xff]  }
 0x1d2   :  { %3105 = vmatprep.mubr.msk.bf16.mxu1 %vm3758_vm0, %v3757_v6  ;;  %3104 = vmatpush3.bf16.msra.mxu1 %v942_v47 }
 0x1d3   :  { %3109 = vmatprep.subr.bf16.mxu1 %v3757_v6 }
 0x2a4   :  { %v918_v14 = vpop.f32.mrb[8].mxu1 }
 0x2a5   :  { %v919_v15 = vadd.f32 %v918_v14, %v3977_v13  ;;  %v3101_v16 = vpop.f32.mrb[9].mxu1 }
 0x2a6   :  { %v921_v17 = vpop.f32.mrb[10].mxu1 }
 0x2a7   :  { %v3102_v18 = vpop.f32.mrb[11].mxu1  ;;  %v925_v19 = vsel %vm924_vm2, %v919_v15, -inf }
 0x2a8   :  { %926 = vmax.xlane.f32.xlu0 %v925_v19 }
 0x335   :  { %v927_v20 = vpop.xlane.xlu0 %926 }
 0x336   :  { %v928_v21 = vsub.f32 %v919_v15, %v927_v20 }
 0x338   :  { %v929_v27 = vmul.f32 1.442695, %v928_v21 }
 0x33a   :  { %3553 = vpow2.f32 %v929_v27 }
 0x344   :  { %v3554_v43 = vpop.eup %3553 }
 0x345   :  { %v931_v44 = vsel %vm924_vm2, %v3554_v43, 0.0 }
 0x346   :  { %932 = vadd.xlane.f32.xlu0 %v931_v44 }
 0x3d3   :  { %v933_v2 = vpop.xlane.xlu0 %932 }
 0x3d4   :  { %3555 = vrcp.f32 %v933_v2  ;;  %v3352_v2 = vld [vmem:[#allocation8 + $0xd0] ss:$8 sps:$4 sm:$0xff]  }
 0x3de   :  { %v3556_v3 = vpop.eup %3555 }
 0x3df   :  { %v935_v4 = vmul.f32 %v3556_v3, %v3554_v43  ;;  %v3357_v3 = vld [vmem:[#allocation8 + $0xe4] ss:$8 sps:$4 sm:$0xff]  }
 0x3e1   :  { %v936_v5 = vpack.c.bf16 %v935_v4, %v935_v4  ;;  %v3355_v4 = vld [vmem:[#allocation8 + $0xe0] ss:$8 sps:$4 sm:$0xff]  }
 0x3e3   :  { %3106 = vmatmul.mubr.msk.bf16.vlgmr.msra.gmra.mrb[12].mxu1 %vm924_vm2, %v936_v5  ;;  %v3360_v5 = vld [vmem:[#allocation8 + $0xf4] ss:$8 sps:$4 sm:$0xff]  }
 0x3e4   :  { %3110 = vmatpush3.bf16.xpose.msra.mxu1 %v3968_v37  ;;  %3111 = vmatprep.mubr.msk.bf16.mxu1 %vm3758_vm0, %v3757_v6 }
 0x3e5   :  { %3115 = vmatprep.subr.bf16.mxu1 %v3757_v6 }
 0x3eb   :  { %3112 = vmatmul.mubr.bf16.vlgmr.msra.gmra.mrb[16].mxu1 %v3956_v23 }
 0x3ec   :  { %3116 = vmatpush3.bf16.msra.mxu1 %v1057_v10  ;;  %3117 = vmatprep.mubr.msk.bf16.mxu1 %vm3758_vm0, %v3757_v6  ;;  %v3354_v10 = vld [vmem:[#allocation8 + $0xd4] ss:$8 sps:$4 sm:$0xff]  }
 0x3ed   :  { %1196 = vmatprep.subr.bf16.mxu1 %v3339_v32 }
 0x4b6   :  { %v978_v12 = vpop.f32.mrb[12].mxu1 }
 0x4b7   :  { %v984_v14 = vpack.c.bf16 %v978_v12, %v978_v12  ;;  %v3107_v15 = vpop.f32.mrb[13].mxu1  ;;  %v3358_v12 = vld [vmem:[#allocation8 + $0xf0] ss:$8 sps:$4 sm:$0xff]  }
 0x4b8   :  { %v981_v16 = vpop.f32.mrb[14].mxu1 }
 0x4b9   :  { %v3108_v17 = vpop.f32.mrb[15].mxu1  ;;  %1350 = vmatmul.mubr.bf16.vlgmr.msra.gmra.mrb[4].mxu0 %v984_v14 }
 0x4ba   :  { %1606 = vmatprep.mubr.bf16.mxu0 %v3759_v7  ;;  %1575 = vmatpush1.bf16.msra.mxu0 %v3337_v33 }
 0x4bb   :  { %1576 = vmatprep.subr.bf16.mxu0 %v3342_v34 }
 0x4be   :  { %v1035_v18 = vpop.f32.mrb[16].mxu1 }
 0x4bf   :  { %v1036_v19 = vadd.f32 %v1035_v18, %v3977_v13  ;;  %v3113_v20 = vpop.f32.mrb[17].mxu1  ;;  %v3340_v13 = vld [vmem:[#allocation8 + $0x90] ss:$8 sps:$4 sm:$0xff]  }
 0x4c0   :  { %v1038_v21 = vpop.f32.mrb[18].mxu1  ;;  %1577 = vmatpush1.bf16.msra.mxu0 %v3340_v13 }
 0x4c1   :  { %v3114_v26 = vpop.f32.mrb[19].mxu1  ;;  %v1041_v39 = vsel %vm924_vm2, %v1036_v19, -inf  ;;  %1578 = vmatprep.subr.bf16.mxu0 %v3345_v35  ;;  %v1364_v21 = vrot.slane %v3966_v36, 4 }
 0x4c2   :  { %1042 = vmax.xlane.f32.xlu1 %v1041_v39 }
 0x4c4   :  { %1579 = vmatpush1.bf16.msra.mxu0 %v3343_v38 }
 0x4c5   :  { %1580 = vmatprep.subr.bf16.mxu0 %v3348_v40 }
 0x4c8   :  { %1581 = vmatpush1.bf16.msra.mxu0 %v3346_v41 }
 0x4c9   :  { %1582 = vmatprep.subr.bf16.mxu0 %v3351_v42 }
 0x4cc   :  { %1583 = vmatpush1.bf16.msra.mxu0 %v3349_v46 }
 0x4cd   :  { %1584 = vmatprep.subr.bf16.mxu0 %v3354_v10 }
 0x4d0   :  { %1585 = vmatpush1.bf16.msra.mxu0 %v3352_v2 }
 0x4d1   :  { %1586 = vmatprep.subr.bf16.mxu0 %v3357_v3 }
 0x4d4   :  { %1587 = vmatpush1.bf16.msra.mxu0 %v3355_v4 }
 0x4d5   :  { %1588 = vmatprep.subr.bf16.mxu0 %v3360_v5 }
 0x4d8   :  { %1589 = vmatpush1.bf16.msra.mxu0 %v3358_v12 }
 0x54f   :  { %v1043_v27 = vpop.xlane.xlu1 %1042 }
 0x550   :  { %v1044_v28 = vsub.f32 %v1036_v19, %v1043_v27  ;;  %v1361_v27 = vrot.slane %v3954_v22, 4 }
 0x552   :  { %v1045_v29 = vmul.f32 1.442695, %v1044_v28  ;;  %v881_v28 = vld [vmem:[#allocation5 + $0x8] sm:$0xff] }
 0x553   :  { %vm1358_vm4 = vcmp.gt.f32.partialorder %v881_v28, 0.5 }
 0x554   :  { %3557 = vpow2.f32 %v1045_v29 }
 0x55e   :  { %v3558_v30 = vpop.eup %3557 }
 0x55f   :  { %v1047_v31 = vsel %vm924_vm2, %v3558_v30, 0.0 }
 0x560   :  { %1048 = vadd.xlane.f32.xlu1 %v1047_v31 }
 0x58c   :  { %v1351_v43 = vpop.f32.mrb[4].mxu0 }
 0x58d   :  { %v1353_v44 = vpop.f32.mrb[5].mxu0 }
 0x58e   :  { %v1355_v45 = vpop.f32.mrb[6].mxu0 }
 0x58f   :  { %v1356_v47 = vpop.f32.mrb[7].mxu0 }
 0x5ed   :  { %v1049_v14 = vpop.xlane.xlu1 %1048 }
 0x5ee   :  { %3559 = vrcp.f32 %v1049_v14 }
 0x5f8   :  { %v3560_v15 = vpop.eup %3559 }
 0x5f9   :  { %v1051_v16 = vmul.f32 %v3560_v15, %v3558_v30 }
 0x5fb   :  { %v1052_v17 = vpack.c.bf16 %v1051_v16, %v1051_v16 }
 0x5fd   :  { %3118 = vmatmul.mubr.msk.bf16.vlgmr.msra.gmra.mrb[20].mxu1 %vm924_vm2, %v1052_v17 }
 0x5fe   :  { %1197 = vmatpush1.bf16.msra.mxu1 %v3337_v33  ;;  %1228 = vmatprep.mubr.bf16.mxu1 %v3759_v7 }
 0x5ff   :  { %1198 = vmatprep.subr.bf16.mxu1 %v3342_v34  ;;  %v1359_v34 = vsel %vm1358_vm4, -10000.0, %v3757_v6 }
 0x602   :  { %1199 = vmatpush1.bf16.msra.mxu1 %v3340_v13 }
 0x603   :  { %1200 = vmatprep.subr.bf16.mxu1 %v3345_v35 }
 0x606   :  { %1201 = vmatpush1.bf16.msra.mxu1 %v3343_v38 }
 0x607   :  { %1202 = vmatprep.subr.bf16.mxu1 %v3348_v40 }
 0x60a   :  { %1203 = vmatpush1.bf16.msra.mxu1 %v3346_v41 }
 0x60b   :  { %1204 = vmatprep.subr.bf16.mxu1 %v3351_v42 }
 0x60e   :  { %1205 = vmatpush1.bf16.msra.mxu1 %v3349_v46 }
 0x60f   :  { %1206 = vmatprep.subr.bf16.mxu1 %v3354_v10 }
 0x612   :  { %1207 = vmatpush1.bf16.msra.mxu1 %v3352_v2 }
 0x613   :  { %1208 = vmatprep.subr.bf16.mxu1 %v3357_v3  ;;  %v1471_v3 = vrot.slane %v3968_v37, 4  ;;  %v1656_v37 = vld [vmem:[%s4210_s5] sm:$0x3] }
 0x614   :  { %v4081_v14 = vrot.slane %v1656_v37, %v3940_v9  ;;  %v4084_v15 = vrot.slane %v1656_v37, %v3948_v11  ;;  %v3361_v37 = vld [vmem:[#allocation10] ss:$16 sps:$4 sm:$0xff]  }
 0x616   :  { %1209 = vmatpush1.bf16.msra.mxu1 %v3355_v4  ;;  %v1468_v4 = vrot.slane %v3956_v23, 4 }
 0x617   :  { %1210 = vmatprep.subr.bf16.mxu1 %v3360_v5 }
 0x61a   :  { %1211 = vmatpush1.bf16.msra.mxu1 %v3358_v12 }
 0x61b   :  { %3121 = vmatprep.subr.bf16.mxu1 %v3757_v6 }
 0x6d0   :  { %v1093_v18 = vpop.f32.mrb[20].mxu1 }
 0x6d1   :  { %v1099_v19 = vpack.c.bf16 %v1093_v18, %v1093_v18  ;;  %v3119_v20 = vpop.f32.mrb[21].mxu1 }
 0x6d2   :  { %v1096_v26 = vpop.f32.mrb[22].mxu1  ;;  %v3577_v20 = vld [vmem:[#allocation2] sm:$0xff] }
 0x6d3   :  { %v3120_v39 = vpop.f32.mrb[23].mxu1  ;;  %1229 = vmatmul.mubr.bf16.vlgmr.msra.gmra.mrb[24].mxu1 %v1099_v19  ;;  %v3578_v26 = vld [vmem:[#allocation2 + $0x8] sm:$0xff] }
 0x6d4   :  { %3122 = vmatpush3.bf16.xpose.msra.mxu1 %v1364_v21  ;;  %3123 = vmatprep.mubr.msk.bf16.mxu1 %vm3758_vm0, %v3757_v6 }
 0x6d5   :  { %3127 = vmatprep.subr.bf16.mxu1 %v3757_v6 }
 0x6db   :  { %3124 = vmatmul.mubr.bf16.vlgmr.msra.gmra.mrb[28].mxu1 %v1361_v27 }
 0x6dc   :  { %3128 = vmatpush3.bf16.msra.mxu1 %v3987_v48  ;;  %3129 = vmatprep.mubr.msk.bf16.mxu1 %vm3758_vm0, %v3757_v6 }
 0x6dd   :  { %3133 = vmatprep.subr.bf16.mxu1 %v3757_v6 }
 0x7a6   :  { %v1230_v36 = vpop.f32.mrb[24].mxu1 }
 0x7a7   :  { %v1352_v29 = vadd.f32 %v1351_v43, %v1230_v36  ;;  %v1232_v30 = vpop.f32.mrb[25].mxu1 }
 0x7a8   :  { %v1354_v31 = vadd.f32 %v1353_v44, %v1232_v30  ;;  %v1234_v32 = vpop.f32.mrb[26].mxu1 }
 0x7a9   :  { %v1235_v33 = vpop.f32.mrb[27].mxu1 }
 0x7ae   :  { %v1400_v13 = vpop.f32.mrb[28].mxu1 }
 0x7af   :  { %v1401_v22 = vadd.f32 %v1400_v13, %v1359_v34  ;;  %v3125_v35 = vpop.f32.mrb[29].mxu1 }
 0x7b0   :  { %v1403_v38 = vpop.f32.mrb[30].mxu1 }
 0x7b1   :  { %v3126_v48 = vpop.f32.mrb[31].mxu1  ;;  %v1406_v40 = vsel %vm924_vm2, %v1401_v22, -inf }
 0x7b2   :  { %1407 = vmax.xlane.f32.xlu0 %v1406_v40 }
 0x83f   :  { %v1408_v41 = vpop.xlane.xlu0 %1407 }
 0x840   :  { %v1409_v42 = vsub.f32 %v1401_v22, %v1408_v41 }
 0x842   :  { %v1410_v45 = vmul.f32 1.442695, %v1409_v42 }
 0x844   :  { %3561 = vpow2.f32 %v1410_v45 }
 0x84e   :  { %v3562_v43 = vpop.eup %3561 }
 0x84f   :  { %v1412_v44 = vsel %vm924_vm2, %v3562_v43, 0.0 }
 0x850   :  { %1413 = vadd.xlane.f32.xlu1 %v1412_v44 }
 0x8dd   :  { %v1414_v46 = vpop.xlane.xlu1 %1413 }
 0x8de   :  { %3563 = vrcp.f32 %v1414_v46 }
 0x8e8   :  { %v3564_v47 = vpop.eup %3563 }
 0x8e9   :  { %v1416_v10 = vmul.f32 %v3564_v47, %v3562_v43  ;;  %v3579_v47 = vld [vmem:[#allocation2 + $0x10] sm:$0xff] }
 0x8eb   :  { %v1417_v2 = vpack.c.bf16 %v1416_v10, %v1416_v10 }
 0x8ed   :  { %3130 = vmatmul.mubr.msk.bf16.vlgmr.msra.gmra.mrb[32].mxu1 %vm924_vm2, %v1417_v2  ;;  %v3580_v2 = vld [vmem:[#allocation2 + $0x18] sm:$0xff] }
 0x8ee   :  { %3134 = vmatpush3.bf16.xpose.msra.mxu1 %v1471_v3  ;;  %3135 = vmatprep.mubr.msk.bf16.mxu1 %vm3758_vm0, %v3757_v6 }
 0x8ef   :  { %3139 = vmatprep.subr.bf16.mxu1 %v3757_v6 }
 0x8f5   :  { %3136 = vmatmul.mubr.bf16.vlgmr.msra.gmra.mrb[36].mxu1 %v1468_v4 }
 0x8f6   :  { %3140 = vmatpush3.bf16.msra.mxu1 %v3989_v49  ;;  %3141 = vmatprep.mubr.msk.bf16.mxu1 %vm3758_vm0, %v3757_v6  ;;  %v1668_v49 = vadd.f32 %v4081_v14, %v1352_v29  ;;  %v1669_v6 = vadd.f32 %v4084_v15, %v1354_v31 }
 0x8f7   :  { %1615 = vmatprep.subr.bf16.mxu1 %v3993_v51 }
 0x8f8   :  { %v1672_v21 = vadd.f32 %v3577_v20, %v1668_v49  ;;  %v1673_v39 = vadd.f32 %v3578_v26, %v1669_v6  ;;  %v3370_v49 = vld [vmem:[#allocation10 + $0x28] ss:$16 sps:$4 sm:$0xff]   ;;  %v3375_v6 = vld [vmem:[#allocation10 + $0x44] ss:$16 sps:$4 sm:$0xff]   ;;  %v3384_v20 = vld [vmem:[#allocation10 + $0x6c] ss:$16 sps:$4 sm:$0xff]  }
 0x8f9   :  { %v3382_v26 = vld [vmem:[#allocation10 + $0x68] ss:$16 sps:$4 sm:$0xff]  }
 0x8fa   :  { %v1676_v28 = vadd.f32 %v1673_v39, %v1672_v21 }
 0x9c0   :  { %v1460_v5 = vpop.f32.mrb[32].mxu1 }
 0x9c1   :  { %v3131_v12 = vpop.f32.mrb[33].mxu1 }
 0x9c2   :  { %v1463_v23 = vpop.f32.mrb[34].mxu1  ;;  %v3364_v12 = vld [vmem:[#allocation10 + $0x8] ss:$16 sps:$4 sm:$0xff]  }
 0x9c3   :  { %v3132_v16 = vpop.f32.mrb[35].mxu1  ;;  %v3366_v23 = vld [vmem:[#allocation10 + $0xc] ss:$16 sps:$4 sm:$0xff]  }
 0x9c4   :  { %v3369_v16 = vld [vmem:[#allocation10 + $0x24] ss:$16 sps:$4 sm:$0xff]  }
 0x9c8   :  { %v1507_v17 = vpop.f32.mrb[36].mxu1 }
 0x9c9   :  { %v1508_v51 = vadd.f32 %v1507_v17, %v1359_v34  ;;  %v3137_v18 = vpop.f32.mrb[37].mxu1  ;;  %v3378_v17 = vld [vmem:[#allocation10 + $0x4c] ss:$16 sps:$4 sm:$0xff]  }
 0x9ca   :  { %v1510_v19 = vpop.f32.mrb[38].mxu1  ;;  %v3376_v18 = vld [vmem:[#allocation10 + $0x48] ss:$16 sps:$4 sm:$0xff]  }
 0x9cb   :  { %v3138_v27 = vpop.f32.mrb[39].mxu1  ;;  %v1513_v36 = vsel %vm924_vm2, %v1508_v51, -inf  ;;  %v3381_v19 = vld [vmem:[#allocation10 + $0x64] ss:$16 sps:$4 sm:$0xff]  }
 0x9cc   :  { %1514 = vmax.xlane.f32.xlu0 %v1513_v36  ;;  %v3390_v27 = vld [vmem:[#allocation10 + $0x8c] ss:$16 sps:$4 sm:$0xff]   ;;  %v3385_v36 = vld [vmem:[#allocation10 + $0x80] ss:$16 sps:$4 sm:$0xff]  }
 0x9d0   :  { %1677 = vadd.xlane.f32.xlu0 %v1676_v28  ;;  %v3388_v28 = vld [vmem:[#allocation10 + $0x88] ss:$16 sps:$4 sm:$0xff]  }
 0xa59   :  { %v1515_v30 = vpop.xlane.xlu0 %1514 }
 0xa5a   :  { %v1516_v32 = vsub.f32 %v1508_v51, %v1515_v30  ;;  %v3373_v51 = vld [vmem:[#allocation10 + $0x40] ss:$16 sps:$4 sm:$0xff]   ;;  %v3393_v30 = vld [vmem:[#allocation10 + $0xa4] ss:$16 sps:$4 sm:$0xff]  }
 0xa5c   :  { %v1517_v33 = vmul.f32 1.442695, %v1516_v32  ;;  %v3396_v32 = vld [vmem:[#allocation10 + $0xac] ss:$16 sps:$4 sm:$0xff]  }
 0xa5d   :  { %v1678_v29 = vpop.xlane.xlu0 %1677 }
 0xa5e   :  { %3565 = vpow2.f32 %v1517_v33  ;;  %v1683_v31 = vmul.f32 0.00390625, %v1678_v29  ;;  %v3391_v33 = vld [vmem:[#allocation10 + $0xa0] ss:$16 sps:$4 sm:$0xff]   ;;  %v3394_v29 = vld [vmem:[#allocation10 + $0xa8] ss:$16 sps:$4 sm:$0xff]  }
 0xa60   :  { %v4089_v13 = vsub.f32 %v1672_v21, %v1683_v31  ;;  %v4091_v34 = vsub.f32 %v1673_v39, %v1683_v31  ;;  %v3379_v21 = vld [vmem:[#allocation10 + $0x60] ss:$16 sps:$4 sm:$0xff]   ;;  %v3387_v39 = vld [vmem:[#allocation10 + $0x84] ss:$16 sps:$4 sm:$0xff]  }
 0xa61   :  { %v3399_v31 = vld [vmem:[#allocation10 + $0xc4] ss:$16 sps:$4 sm:$0xff]  }
 0xa62   :  { %v1689_v22 = vmul.f32 %v4089_v13, %v4089_v13  ;;  %v1690_v35 = vmul.f32 %v4091_v34, %v4091_v34 }
 0xa64   :  { %v1693_v38 = vadd.f32 %v1690_v35, %v1689_v22  ;;  %v3402_v22 = vld [vmem:[#allocation10 + $0xcc] ss:$16 sps:$4 sm:$0xff]   ;;  %v3397_v35 = vld [vmem:[#allocation10 + $0xc0] ss:$16 sps:$4 sm:$0xff]  }
 0xa66   :  { %1694 = vadd.xlane.f32.xlu0 %v1693_v38  ;;  %v3400_v38 = vld [vmem:[#allocation10 + $0xc8] ss:$16 sps:$4 sm:$0xff]  }
 0xa68   :  { %v3566_v48 = vpop.eup %3565 }
 0xa69   :  { %v1519_v40 = vsel %vm924_vm2, %v3566_v48, 0.0 }
 0xa6a   :  { %1520 = vadd.xlane.f32.xlu1 %v1519_v40  ;;  %v3408_v40 = vld [vmem:[#allocation10 + $0xec] ss:$16 sps:$4 sm:$0xff]  }
 0xaf7   :  { %v1521_v41 = vpop.xlane.xlu1 %1520 }
 0xaf8   :  { %3567 = vrcp.f32 %v1521_v41  ;;  %v3403_v41 = vld [vmem:[#allocation10 + $0xe0] ss:$16 sps:$4 sm:$0xff]  }
 0xb02   :  { %v3568_v42 = vpop.eup %3567 }
 0xb03   :  { %v1523_v45 = vmul.f32 %v3568_v42, %v3566_v48  ;;  %v3405_v48 = vld [vmem:[#allocation10 + $0xe4] ss:$16 sps:$4 sm:$0xff]   ;;  %v3406_v42 = vld [vmem:[#allocation10 + $0xe8] ss:$16 sps:$4 sm:$0xff]  }
 0xb05   :  { %v1524_v43 = vpack.c.bf16 %v1523_v45, %v1523_v45  ;;  %v3411_v45 = vld [vmem:[#allocation10 + $0x104] ss:$16 sps:$4 sm:$0xff]  }
 0xb07   :  { %3142 = vmatmul.mubr.msk.bf16.vlgmr.msra.gmra.mrb[40].mxu1 %vm924_vm2, %v1524_v43  ;;  %v3414_v43 = vld [vmem:[#allocation10 + $0x10c] ss:$16 sps:$4 sm:$0xff]  }
 0xb08   :  { %1616 = vmatpush1.bf16.msra.mxu1 %v3991_v50  ;;  %1647 = vmatprep.mubr.bf16.mxu1 %v3759_v7  ;;  %v1466_v50 = vpack.c.bf16 %v1460_v5, %v1460_v5  ;;  %v3363_v5 = vld [vmem:[#allocation10 + $0x4] ss:$16 sps:$4 sm:$0xff]  }
 0xb09   :  { %1617 = vmatprep.subr.bf16.mxu1 %v3995_v52  ;;  %2149 = vmatprep.subr.bf16.mxu0 %v3363_v5  ;;  %v3436_v5 = vld [vmem:[#allocation10 + $0x188] ss:$16 sps:$4 sm:$0xff]  }
 0xb0c   :  { %1618 = vmatpush1.bf16.msra.mxu1 %v3999_v53 }
 0xb0d   :  { %1619 = vmatprep.subr.bf16.mxu1 %v4002_v54 }
 0xb10   :  { %1620 = vmatpush1.bf16.msra.mxu1 %v4005_v55 }
 0xb11   :  { %1621 = vmatprep.subr.bf16.mxu1 %v4008_v56 }
 0xb14   :  { %1622 = vmatpush1.bf16.msra.mxu1 %v4011_v57 }
 0xb15   :  { %1623 = vmatprep.subr.bf16.mxu1 %v4014_v58 }
 0xb18   :  { %1624 = vmatpush1.bf16.msra.mxu1 %v4017_v59 }
 0xb19   :  { %1625 = vmatprep.subr.bf16.mxu1 %v4020_v60 }
 0xb1c   :  { %1626 = vmatpush1.bf16.msra.mxu1 %v4023_v61 }
 0xb1d   :  { %1627 = vmatprep.subr.bf16.mxu1 %v4026_v62 }
 0xb20   :  { %1628 = vmatpush1.bf16.msra.mxu1 %v4029_v63 }
 0xb21   :  { %1629 = vmatprep.subr.bf16.mxu1 %v4032_v0 }
 0xb24   :  { %1630 = vmatpush1.bf16.msra.mxu1 %v4035_v1 }
 0xb25   :  { %2192 = vmatprep.subr.bf16.mxu1 %v3366_v23  ;;  %v3444_v23 = vld [vmem:[#allocation10 + $0x1ac] ss:$16 sps:$4 sm:$0xff]  }
 0xb27   :  { %1648 = vmatmul.mubr.bf16.vlgmr.msra.gmra.mrb[44].mxu1 %v1466_v50  ;;  %v3409_v50 = vld [vmem:[#allocation10 + $0x100] ss:$16 sps:$4 sm:$0xff]  }
 0xb28   :  { %2193 = vmatpush1.bf16.msra.mxu1 %v3364_v12  ;;  %v3441_v12 = vld [vmem:[#allocation10 + $0x1a4] ss:$16 sps:$4 sm:$0xff]  }
 0xbda   :  { %v1567_v52 = vpop.f32.mrb[40].mxu1 }
 0xbdb   :  { %v1573_v53 = vpack.c.bf16 %v1567_v52, %v1567_v52  ;;  %v3143_v54 = vpop.f32.mrb[41].mxu1  ;;  %v3412_v52 = vld [vmem:[#allocation10 + $0x108] ss:$16 sps:$4 sm:$0xff]  }
 0xbdc   :  { %v1570_v55 = vpop.f32.mrb[42].mxu1  ;;  %v3420_v54 = vld [vmem:[#allocation10 + $0x12c] ss:$16 sps:$4 sm:$0xff]  }
 0xbdd   :  { %v3144_v56 = vpop.f32.mrb[43].mxu1  ;;  %1607 = vmatmul.mubr.bf16.vlgmr.msra.gmra.mrb[8].mxu0 %v1573_v53  ;;  %v3417_v53 = vld [vmem:[#allocation10 + $0x124] ss:$16 sps:$4 sm:$0xff]   ;;  %v3415_v55 = vld [vmem:[#allocation10 + $0x120] ss:$16 sps:$4 sm:$0xff]  }
 0xbde   :  { %2150 = vmatpush1.bf16.msra.mxu0 %v3361_v37  ;;  %v3418_v56 = vld [vmem:[#allocation10 + $0x128] ss:$16 sps:$4 sm:$0xff]   ;;  %v3433_v37 = vld [vmem:[#allocation10 + $0x180] ss:$16 sps:$4 sm:$0xff]  }
 0xbdf   :  { %2151 = vmatprep.subr.bf16.mxu0 %v3369_v16  ;;  %v3439_v16 = vld [vmem:[#allocation10 + $0x1a0] ss:$16 sps:$4 sm:$0xff]  }
 0xbfa   :  { %v1649_v57 = vpop.f32.mrb[44].mxu1 }
 0xbfb   :  { %v1651_v58 = vpop.f32.mrb[45].mxu1 }
 0xbfc   :  { %v1653_v59 = vpop.f32.mrb[46].mxu1 }
 0xbfd   :  { %v1654_v60 = vpop.f32.mrb[47].mxu1 }
 0xcb0   :  { %v1608_v61 = vpop.f32.mrb[8].mxu0 }
 0xcb1   :  { %v1650_v62 = vadd.f32 %v1649_v57, %v1608_v61  ;;  %v1610_v7 = vpop.f32.mrb[9].mxu0 }
 0xcb2   :  { %v1652_v63 = vadd.f32 %v1651_v58, %v1610_v7  ;;  %v1612_v44 = vpop.f32.mrb[10].mxu0 }
 0xcb3   :  { %v1670_v0 = vadd.f32 %v4081_v14, %v1650_v62  ;;  %v1613_v1 = vpop.f32.mrb[11].mxu0  ;;  %v3372_v14 = vld [vmem:[#allocation10 + $0x2c] ss:$16 sps:$4 sm:$0xff]  }
 0xcb4   :  { %v1671_v46 = vadd.f32 %v4084_v15, %v1652_v63  ;;  %v3367_v15 = vld [vmem:[#allocation10 + $0x20] ss:$16 sps:$4 sm:$0xff]   ;;  %2194 = vmatprep.subr.bf16.mxu1 %v3372_v14  ;;  %v3423_v63 = vld [vmem:[#allocation10 + $0x144] ss:$16 sps:$4 sm:$0xff]   ;;  %v3426_v44 = vld [vmem:[#allocation10 + $0x14c] ss:$16 sps:$4 sm:$0xff]  }
 0xcb5   :  { %v4117_v10 = vadd.f32 %v3579_v47, %v1670_v0  ;;  %2152 = vmatpush1.bf16.msra.mxu0 %v3367_v15  ;;  %2195 = vmatpush1.bf16.msra.mxu1 %v3370_v49  ;;  %v3421_v0 = vld [vmem:[#allocation10 + $0x140] ss:$16 sps:$4 sm:$0xff]   ;;  %v3424_v1 = vld [vmem:[#allocation10 + $0x148] ss:$16 sps:$4 sm:$0xff]   ;;  %v3432_v47 = vld [vmem:[#allocation10 + $0x16c] ss:$16 sps:$4 sm:$0xff]  }
 0xcb6   :  { %v4119_v3 = vadd.f32 %v3580_v2, %v1671_v46  ;;  %2153 = vmatprep.subr.bf16.mxu0 %v3375_v6  ;;  %2196 = vmatprep.subr.bf16.mxu1 %v3378_v17  ;;  %v3429_v46 = vld [vmem:[#allocation10 + $0x164] ss:$16 sps:$4 sm:$0xff]   ;;  %v3430_v2 = vld [vmem:[#allocation10 + $0x168] ss:$16 sps:$4 sm:$0xff]   ;;  %v3445_v15 = vld [vmem:[#allocation10 + $0x1c0] ss:$16 sps:$4 sm:$0xff]  }
 0xcb7   :  { %v3442_v14 = vld [vmem:[#allocation10 + $0x1a8] ss:$16 sps:$4 sm:$0xff]   ;;  %v3447_v49 = vld [vmem:[#allocation10 + $0x1c4] ss:$16 sps:$4 sm:$0xff]   ;;  %v3450_v17 = vld [vmem:[#allocation10 + $0x1cc] ss:$16 sps:$4 sm:$0xff]  }
 0xcb8   :  { %v1679_v4 = vadd.f32 %v4119_v3, %v4117_v10  ;;  %v3448_v6 = vld [vmem:[#allocation10 + $0x1c8] ss:$16 sps:$4 sm:$0xff]  }
 0xcb9   :  { %2154 = vmatpush1.bf16.msra.mxu0 %v3373_v51  ;;  %2197 = vmatpush1.bf16.msra.mxu1 %v3376_v18  ;;  %v3453_v51 = vld [vmem:[#allocation10 + $0x1e4] ss:$16 sps:$4 sm:$0xff]   ;;  %v3456_v18 = vld [vmem:[#allocation10 + $0x1ec] ss:$16 sps:$4 sm:$0xff]  }
 0xcba   :  { %1680 = vadd.xlane.f32.xlu1 %v1679_v4  ;;  %2155 = vmatprep.subr.bf16.mxu0 %v3381_v19  ;;  %v3438_v4 = vld [vmem:[#allocation10 + $0x18c] ss:$16 sps:$4 sm:$0xff]   ;;  %v3451_v19 = vld [vmem:[#allocation10 + $0x1e0] ss:$16 sps:$4 sm:$0xff]  }
 0xcbb   :  { %2198 = vmatprep.subr.bf16.mxu1 %v3384_v20  ;;  %v3454_v20 = vld [vmem:[#allocation10 + $0x1e8] ss:$16 sps:$4 sm:$0xff]  }
 0xcbd   :  { %2156 = vmatpush1.bf16.msra.mxu0 %v3379_v21  ;;  %2199 = vmatpush1.bf16.msra.mxu1 %v3382_v26  ;;  %v3459_v21 = vld [vmem:[#allocation11 + $0x4] ss:$8 sps:$4 sm:$0xff]   ;;  %v1695_v26 = vpop.xlane.xlu0 %1694 }
 0xcbe   :  { %2157 = vmatprep.subr.bf16.mxu0 %v3387_v39  ;;  %2200 = vmatprep.subr.bf16.mxu1 %v3390_v27  ;;  %v1699_v39 = vmul.f32 0.00390625, %v1695_v26  ;;  %v3507_v26 = vld [vmem:[#allocation11 + $0x104] ss:$8 sps:$4 sm:$0xff]  }
 0xcc0   :  { %v1701_v27 = vadd.f32 1e-05, %v1699_v39  ;;  %v1807_v39 = vld [vmem:[%s4214_s9] sm:$0xf] }
 0xcc1   :  { %2158 = vmatpush1.bf16.msra.mxu0 %v3385_v36  ;;  %2201 = vmatpush1.bf16.msra.mxu1 %v3388_v28 }
 0xcc2   :  { %2159 = vmatprep.subr.bf16.mxu0 %v3393_v30  ;;  %2202 = vmatprep.subr.bf16.mxu1 %v3396_v32  ;;  %3569 = vrsqrt.f32 %v1701_v27  ;;  %v1812_v27 = vrot.slane %v1807_v39, %v3940_v9 }
 0xcc5   :  { %2160 = vmatpush1.bf16.msra.mxu0 %v3391_v33  ;;  %2203 = vmatpush1.bf16.msra.mxu1 %v3394_v29  ;;  %v1709_v33 = vld [vmem:[%s4211_s6] sm:$0x3] }
 0xcc6   :  { %2161 = vmatprep.subr.bf16.mxu0 %v3399_v31  ;;  %2204 = vmatprep.subr.bf16.mxu1 %v3402_v22  ;;  %v1714_v22 = vrot.slane %v1709_v33, %v3940_v9 }
 0xcc9   :  { %2162 = vmatpush1.bf16.msra.mxu0 %v3397_v35  ;;  %2205 = vmatpush1.bf16.msra.mxu1 %v3400_v38  ;;  %v1718_v35 = vrot.slane %v1709_v33, %v3948_v11  ;;  %v1725_v38 = vld [vmem:[%s4212_s7] sm:$0x3] }
 0xcca   :  { %2163 = vmatprep.subr.bf16.mxu0 %v3405_v48  ;;  %2206 = vmatprep.subr.bf16.mxu1 %v3408_v40  ;;  %v1730_v40 = vrot.slane %v1725_v38, %v3940_v9 }
 0xccc   :  { %v3570_v32 = vpop.eup %3569 }
 0xccd   :  { %2164 = vmatpush1.bf16.msra.mxu0 %v3403_v41  ;;  %2207 = vmatpush1.bf16.msra.mxu1 %v3406_v42  ;;  %v1705_v29 = vmul.f32 %v3570_v32, %v4089_v13  ;;  %v1706_v31 = vmul.f32 %v3570_v32, %v4091_v34  ;;  %v1734_v41 = vrot.slane %v1725_v38, %v3948_v11 }
 0xcce   :  { %2165 = vmatprep.subr.bf16.mxu0 %v3411_v45  ;;  %2208 = vmatprep.subr.bf16.mxu1 %v3414_v43 }
 0xccf   :  { %v1722_v13 = vmul.f32 %v1718_v35, %v1706_v31  ;;  %v1721_v43 = vmul.f32 %v1714_v22, %v1705_v29 }
 0xcd1   :  { %2166 = vmatpush1.bf16.msra.mxu0 %v3409_v50  ;;  %2209 = vmatpush1.bf16.msra.mxu1 %v3412_v52  ;;  %v4147_v52 = vadd.f32 %v1734_v41, %v1722_v13 }
 0xcd2   :  { %2167 = vmatprep.subr.bf16.mxu0 %v3417_v53  ;;  %2210 = vmatprep.subr.bf16.mxu1 %v3420_v54  ;;  %v4151_v54 = vadd.f32 %v1730_v40, %v1721_v43 }
 0xcd5   :  { %2168 = vmatpush1.bf16.msra.mxu0 %v3415_v55  ;;  %2211 = vmatpush1.bf16.msra.mxu1 %v3418_v56 }
 0xcd6   :  { %2169 = vmatprep.subr.bf16.mxu0 %v3423_v63  ;;  %2212 = vmatprep.subr.bf16.mxu1 %v3426_v44  ;;  %v3466_v63 = vld [vmem:[#allocation11 + $0x30] ss:$8 sps:$4 sm:$0xff]   ;;  %v3471_v44 = vld [vmem:[#allocation11 + $0x44] ss:$8 sps:$4 sm:$0xff]  }
 0xcd9   :  { %2170 = vmatpush1.bf16.msra.mxu0 %v3421_v0  ;;  %2213 = vmatpush1.bf16.msra.mxu1 %v3424_v1  ;;  %v3469_v0 = vld [vmem:[#allocation11 + $0x40] ss:$8 sps:$4 sm:$0xff]   ;;  %v3474_v1 = vld [vmem:[#allocation11 + $0x54] ss:$8 sps:$4 sm:$0xff]  }
 0xcda   :  { %2171 = vmatprep.subr.bf16.mxu0 %v3429_v46  ;;  %2214 = vmatprep.subr.bf16.mxu1 %v3432_v47  ;;  %v3472_v46 = vld [vmem:[#allocation11 + $0x50] ss:$8 sps:$4 sm:$0xff]   ;;  %v3477_v47 = vld [vmem:[#allocation11 + $0x64] ss:$8 sps:$4 sm:$0xff]  }
 0xcdd   :  { %2215 = vmatpush1.bf16.msra.mxu1 %v3430_v2  ;;  %v3480_v2 = vld [vmem:[#allocation11 + $0x74] ss:$8 sps:$4 sm:$0xff]  }
 0xcde   :  { %2216 = vmatprep.subr.bf16.mxu1 %v3438_v4  ;;  %v3483_v4 = vld [vmem:[#allocation11 + $0x84] ss:$8 sps:$4 sm:$0xff]  }
 0xce1   :  { %2217 = vmatpush1.bf16.msra.mxu1 %v3436_v5  ;;  %v3486_v5 = vld [vmem:[#allocation11 + $0x94] ss:$8 sps:$4 sm:$0xff]  }
 0xce2   :  { %2218 = vmatprep.subr.bf16.mxu1 %v3444_v23  ;;  %v3489_v23 = vld [vmem:[#allocation11 + $0xa4] ss:$8 sps:$4 sm:$0xff]  }
 0xce5   :  { %2219 = vmatpush1.bf16.msra.mxu1 %v3442_v14  ;;  %v3492_v14 = vld [vmem:[#allocation11 + $0xb4] ss:$8 sps:$4 sm:$0xff]  }
 0xce6   :  { %2220 = vmatprep.subr.bf16.mxu1 %v3450_v17  ;;  %v3498_v17 = vld [vmem:[#allocation11 + $0xd4] ss:$8 sps:$4 sm:$0xff]  }
 0xce9   :  { %2221 = vmatpush1.bf16.msra.mxu1 %v3448_v6  ;;  %v3493_v6 = vld [vmem:[#allocation11 + $0xc0] ss:$8 sps:$4 sm:$0xff]  }
 0xcea   :  { %2222 = vmatprep.subr.bf16.mxu1 %v3456_v18  ;;  %v3501_v18 = vld [vmem:[#allocation11 + $0xe4] ss:$8 sps:$4 sm:$0xff]  }
 0xced   :  { %2223 = vmatpush1.bf16.msra.mxu1 %v3454_v20  ;;  %v3504_v20 = vld [vmem:[#allocation11 + $0xf4] ss:$8 sps:$4 sm:$0xff]  }
 0xd47   :  { %v1681_v57 = vpop.xlane.xlu1 %1680 }
 0xd48   :  { %v1684_v58 = vmul.f32 0.00390625, %v1681_v57 }
 0xd4a   :  { %v4124_v59 = vsub.f32 %v4117_v10, %v1684_v58  ;;  %v4127_v60 = vsub.f32 %v4119_v3, %v1684_v58  ;;  %v3427_v10 = vld [vmem:[#allocation10 + $0x160] ss:$16 sps:$4 sm:$0xff]   ;;  %v3435_v3 = vld [vmem:[#allocation10 + $0x184] ss:$16 sps:$4 sm:$0xff]  }
 0xd4b   :  { %2172 = vmatpush1.bf16.msra.mxu0 %v3427_v10  ;;  %v3457_v58 = vld [vmem:[#allocation11] ss:$8 sps:$4 sm:$0xff]  }
 0xd4c   :  { %v1691_v61 = vmul.f32 %v4124_v59, %v4124_v59  ;;  %v1692_v62 = vmul.f32 %v4127_v60, %v4127_v60  ;;  %2173 = vmatprep.subr.bf16.mxu0 %v3435_v3  ;;  %v3475_v10 = vld [vmem:[#allocation11 + $0x60] ss:$8 sps:$4 sm:$0xff]   ;;  %v3478_v3 = vld [vmem:[#allocation11 + $0x70] ss:$8 sps:$4 sm:$0xff]  }
 0xd4e   :  { %v1696_v7 = vadd.f32 %v1692_v62, %v1691_v61  ;;  %v3465_v61 = vld [vmem:[#allocation11 + $0x24] ss:$8 sps:$4 sm:$0xff]   ;;  %v3463_v62 = vld [vmem:[#allocation11 + $0x20] ss:$8 sps:$4 sm:$0xff]  }
 0xd4f   :  { %2174 = vmatpush1.bf16.msra.mxu0 %v3433_v37  ;;  %v3481_v37 = vld [vmem:[#allocation11 + $0x80] ss:$8 sps:$4 sm:$0xff]  }
 0xd50   :  { %1697 = vadd.xlane.f32.xlu1 %v1696_v7  ;;  %2175 = vmatprep.subr.bf16.mxu0 %v3441_v12  ;;  %v3468_v7 = vld [vmem:[#allocation11 + $0x34] ss:$8 sps:$4 sm:$0xff]   ;;  %v3484_v12 = vld [vmem:[#allocation11 + $0x90] ss:$8 sps:$4 sm:$0xff]  }
 0xd53   :  { %2176 = vmatpush1.bf16.msra.mxu0 %v3439_v16  ;;  %v3487_v16 = vld [vmem:[#allocation11 + $0xa0] ss:$8 sps:$4 sm:$0xff]  }
 0xd54   :  { %2177 = vmatprep.subr.bf16.mxu0 %v3447_v49  ;;  %v3495_v49 = vld [vmem:[#allocation11 + $0xc4] ss:$8 sps:$4 sm:$0xff]  }
 0xd57   :  { %2178 = vmatpush1.bf16.msra.mxu0 %v3445_v15  ;;  %v3490_v15 = vld [vmem:[#allocation11 + $0xb0] ss:$8 sps:$4 sm:$0xff]  }
 0xd58   :  { %2179 = vmatprep.subr.bf16.mxu0 %v3453_v51  ;;  %v3496_v51 = vld [vmem:[#allocation11 + $0xd0] ss:$8 sps:$4 sm:$0xff]  }
 0xd5b   :  { %2180 = vmatpush1.bf16.msra.mxu0 %v3451_v19  ;;  %v3499_v19 = vld [vmem:[#allocation11 + $0xe0] ss:$8 sps:$4 sm:$0xff]  }
 0xd5c   :  { %2643 = vmatprep.subr.bf16.mxu0 %v3459_v21  ;;  %v3502_v21 = vld [vmem:[#allocation11 + $0xf0] ss:$8 sps:$4 sm:$0xff]  }
 0xddd   :  { %v1698_v36 = vpop.xlane.xlu1 %1697 }
 0xdde   :  { %v1700_v28 = vmul.f32 0.00390625, %v1698_v36  ;;  %v1820_v36 = vrot.slane %v1807_v39, %v245_v24 }
 0xde0   :  { %v1702_v30 = vadd.f32 1e-05, %v1700_v28  ;;  %v1816_v28 = vrot.slane %v1807_v39, %v3948_v11 }
 0xde2   :  { %3571 = vrsqrt.f32 %v1702_v30  ;;  %v1824_v30 = vrot.slane %v1807_v39, %v249_v25  ;;  %v3546_v39 = vld [vmem:[#allocation11 + $0x1d4] ss:$8 sps:$4 sm:$0xff]  }
 0xdec   :  { %v3572_v48 = vpop.eup %3571 }
 0xded   :  { %v1707_v42 = vmul.f32 %v3572_v48, %v4124_v59  ;;  %v1708_v45 = vmul.f32 %v3572_v48, %v4127_v60  ;;  %v3462_v59 = vld [vmem:[#allocation11 + $0x14] ss:$8 sps:$4 sm:$0xff]   ;;  %v3460_v60 = vld [vmem:[#allocation11 + $0x10] ss:$8 sps:$4 sm:$0xff]  }
 0xdef   :  { %v1724_v34 = vmul.f32 %v1718_v35, %v1708_v45  ;;  %v1723_v50 = vmul.f32 %v1714_v22, %v1707_v42 }
 0xdf1   :  { %v4149_v53 = vadd.f32 %v1734_v41, %v1724_v34  ;;  %v4153_v55 = vadd.f32 %v1730_v40, %v1723_v50 }
 0xdf3   :  { %v1742_v56 = vpack.c.bf16 %v4149_v53, %v4147_v52  ;;  %v1741_v57 = vpack.c.bf16 %v4153_v55, %v4151_v54 }
 0xdf5   :  { %2181 = vmatprep.mubr.bf16.mxu0 %v1742_v56  ;;  %2224 = vmatprep.mubr.bf16.mxu1 %v1742_v56 }
 0xdf6   :  { %2182 = vmatmul.mubr.bf16.vlgmr.msra.gmra.mrb[12].mxu0 %v1741_v57  ;;  %2225 = vmatmul.mubr.bf16.vlgmr.msra.gmra.mrb[48].mxu1 %v1741_v57 }
 0xdf7   :  { %2644 = vmatpush1.bf16.msra.mxu0 %v3457_v58 }
 0xdf8   :  { %2645 = vmatprep.subr.bf16.mxu0 %v3462_v59 }
 0xdfb   :  { %2646 = vmatpush1.bf16.msra.mxu0 %v3460_v60 }
 0xdfc   :  { %2647 = vmatprep.subr.bf16.mxu0 %v3465_v61 }
 0xdff   :  { %2648 = vmatpush1.bf16.msra.mxu0 %v3463_v62 }
 0xe00   :  { %2649 = vmatprep.subr.bf16.mxu0 %v3468_v7 }
 0xe03   :  { %2650 = vmatpush1.bf16.msra.mxu0 %v3466_v63 }
 0xe04   :  { %2651 = vmatprep.subr.bf16.mxu0 %v3471_v44  ;;  %v3505_v44 = vld [vmem:[#allocation11 + $0x100] ss:$8 sps:$4 sm:$0xff]  }
 0xe07   :  { %2652 = vmatpush1.bf16.msra.mxu0 %v3469_v0  ;;  %v3510_v0 = vld [vmem:[#allocation11 + $0x114] ss:$8 sps:$4 sm:$0xff]  }
 0xe08   :  { %2653 = vmatprep.subr.bf16.mxu0 %v3474_v1  ;;  %v3508_v1 = vld [vmem:[#allocation11 + $0x110] ss:$8 sps:$4 sm:$0xff]  }
 0xe0b   :  { %2654 = vmatpush1.bf16.msra.mxu0 %v3472_v46  ;;  %v3513_v46 = vld [vmem:[#allocation11 + $0x124] ss:$8 sps:$4 sm:$0xff]  }
 0xe0c   :  { %2655 = vmatprep.subr.bf16.mxu0 %v3477_v47  ;;  %v3511_v47 = vld [vmem:[#allocation11 + $0x120] ss:$8 sps:$4 sm:$0xff]  }
 0xe0f   :  { %2656 = vmatpush1.bf16.msra.mxu0 %v3475_v10  ;;  %v3516_v10 = vld [vmem:[#allocation11 + $0x134] ss:$8 sps:$4 sm:$0xff]  }
 0xe10   :  { %2657 = vmatprep.subr.bf16.mxu0 %v3480_v2  ;;  %v3514_v2 = vld [vmem:[#allocation11 + $0x130] ss:$8 sps:$4 sm:$0xff]  }
 0xe13   :  { %2658 = vmatpush1.bf16.msra.mxu0 %v3478_v3  ;;  %v3519_v3 = vld [vmem:[#allocation11 + $0x144] ss:$8 sps:$4 sm:$0xff]  }
 0xe14   :  { %2659 = vmatprep.subr.bf16.mxu0 %v3483_v4  ;;  %v3517_v4 = vld [vmem:[#allocation11 + $0x140] ss:$8 sps:$4 sm:$0xff]  }
 0xe17   :  { %2660 = vmatpush1.bf16.msra.mxu0 %v3481_v37  ;;  %v3522_v37 = vld [vmem:[#allocation11 + $0x154] ss:$8 sps:$4 sm:$0xff]  }
 0xe18   :  { %2661 = vmatprep.subr.bf16.mxu0 %v3486_v5  ;;  %v3520_v5 = vld [vmem:[#allocation11 + $0x150] ss:$8 sps:$4 sm:$0xff]  }
 0xe1b   :  { %2662 = vmatpush1.bf16.msra.mxu0 %v3484_v12  ;;  %v3525_v12 = vld [vmem:[#allocation11 + $0x164] ss:$8 sps:$4 sm:$0xff]  }
 0xe1c   :  { %2663 = vmatprep.subr.bf16.mxu0 %v3489_v23  ;;  %v3523_v23 = vld [vmem:[#allocation11 + $0x160] ss:$8 sps:$4 sm:$0xff]  }
 0xe1f   :  { %2664 = vmatpush1.bf16.msra.mxu0 %v3487_v16  ;;  %v3528_v16 = vld [vmem:[#allocation11 + $0x174] ss:$8 sps:$4 sm:$0xff]  }
 0xe20   :  { %2665 = vmatprep.subr.bf16.mxu0 %v3492_v14  ;;  %v3526_v14 = vld [vmem:[#allocation11 + $0x170] ss:$8 sps:$4 sm:$0xff]  }
 0xe23   :  { %2666 = vmatpush1.bf16.msra.mxu0 %v3490_v15  ;;  %v3531_v15 = vld [vmem:[#allocation11 + $0x184] ss:$8 sps:$4 sm:$0xff]  }
 0xe24   :  { %2667 = vmatprep.subr.bf16.mxu0 %v3495_v49  ;;  %v3529_v49 = vld [vmem:[#allocation11 + $0x180] ss:$8 sps:$4 sm:$0xff]  }
 0xe27   :  { %2668 = vmatpush1.bf16.msra.mxu0 %v3493_v6  ;;  %v3534_v6 = vld [vmem:[#allocation11 + $0x194] ss:$8 sps:$4 sm:$0xff]  }
 0xe28   :  { %2669 = vmatprep.subr.bf16.mxu0 %v3498_v17  ;;  %v3532_v17 = vld [vmem:[#allocation11 + $0x190] ss:$8 sps:$4 sm:$0xff]  }
 0xe2b   :  { %2670 = vmatpush1.bf16.msra.mxu0 %v3496_v51  ;;  %v3537_v51 = vld [vmem:[#allocation11 + $0x1a4] ss:$8 sps:$4 sm:$0xff]  }
 0xe2c   :  { %2671 = vmatprep.subr.bf16.mxu0 %v3501_v18  ;;  %v3535_v18 = vld [vmem:[#allocation11 + $0x1a0] ss:$8 sps:$4 sm:$0xff]  }
 0xe2f   :  { %2672 = vmatpush1.bf16.msra.mxu0 %v3499_v19  ;;  %v3540_v19 = vld [vmem:[#allocation11 + $0x1b4] ss:$8 sps:$4 sm:$0xff]  }
 0xe30   :  { %2673 = vmatprep.subr.bf16.mxu0 %v3504_v20  ;;  %v3538_v20 = vld [vmem:[#allocation11 + $0x1b0] ss:$8 sps:$4 sm:$0xff]  }
 0xe33   :  { %2674 = vmatpush1.bf16.msra.mxu0 %v3502_v21  ;;  %v3543_v21 = vld [vmem:[#allocation11 + $0x1c4] ss:$8 sps:$4 sm:$0xff]  }
 0xe34   :  { %2686 = vmatprep.subr.bf16.mxu0 %v3507_v26  ;;  %v3541_v26 = vld [vmem:[#allocation11 + $0x1c0] ss:$8 sps:$4 sm:$0xff]  }
 0xec9   :  { %v2183_v32 = vpop.f32.mrb[12].mxu0  ;;  %v2226_v33 = vpop.f32.mrb[48].mxu1 }
 0xeca   :  { %v2184_v29 = vadd.f32 %v2183_v32, %v1812_v27  ;;  %v2227_v31 = vadd.f32 %v2226_v33, %v1820_v36  ;;  %v2185_v22 = vpop.f32.mrb[13].mxu0  ;;  %v2228_v35 = vpop.f32.mrb[49].mxu1  ;;  %v3550_v32 = vld [vmem:[#allocation11 + $0x1f0] ss:$8 sps:$4 sm:$0xff]  }
 0xecb   :  { %v2186_v38 = vadd.f32 %v2185_v22, %v1816_v28  ;;  %v2229_v48 = vadd.f32 %v2228_v35, %v1824_v30  ;;  %v2187_v40 = vpop.f32.mrb[14].mxu0  ;;  %v2230_v41 = vpop.f32.mrb[50].mxu1  ;;  %v2311_v33 = vld [vmem:[%s4216_s11] sm:$0x3] }
 0xecc   :  { %v2188_v42 = vadd.f32 %v2187_v40, %v1812_v27  ;;  %v2231_v45 = vadd.f32 %v2230_v41, %v1820_v36  ;;  %v2189_v13 = vpop.f32.mrb[15].mxu0  ;;  %v2232_v43 = vpop.f32.mrb[51].mxu1  ;;  %v2235_v50 = vmax.f32 %v2184_v29, 0.0  ;;  %v2237_v56 = vmax.f32 %v2227_v31, 0.0  ;;  %v3544_v27 = vld [vmem:[#allocation11 + $0x1d0] ss:$8 sps:$4 sm:$0xff]  }
 0xecd   :  { %v2190_v24 = vadd.f32 %v2189_v13, %v1816_v28  ;;  %v2233_v34 = vadd.f32 %v2232_v43, %v1824_v30  ;;  %v2236_v57 = vmax.f32 %v2186_v38, 0.0  ;;  %v2238_v58 = vmax.f32 %v2229_v48, 0.0  ;;  %v3549_v36 = vld [vmem:[#allocation11 + $0x1e4] ss:$8 sps:$4 sm:$0xff]   ;;  %v3547_v28 = vld [vmem:[#allocation11 + $0x1e0] ss:$8 sps:$4 sm:$0xff]  }
 0xece   :  { %v2239_v8 = vmax.f32 %v2188_v42, 0.0  ;;  %v2241_v25 = vmax.f32 %v2231_v45, 0.0  ;;  %v3552_v30 = vld [vmem:[#allocation11 + $0x1f4] ss:$8 sps:$4 sm:$0xff]   ;;  %v2316_v29 = vrot.slane %v2311_v33, %v3940_v9  ;;  %v2320_v31 = vrot.slane %v2311_v33, %v3948_v11 }
 0xecf   :  { %v2240_v59 = vmax.f32 %v2190_v24, 0.0  ;;  %v2242_v60 = vmax.f32 %v2233_v34, 0.0 }
 0xed0   :  { %v2243_v61 = vpack.c.bf16 %v2239_v8, %v2235_v50  ;;  %v4168_v62 = vpack.c.bf16 %v2241_v25, %v2237_v56 }
 0xed1   :  { %v2244_v7 = vpack.c.bf16 %v2240_v59, %v2236_v57  ;;  %v2246_v63 = vpack.c.bf16 %v2242_v60, %v2238_v58 }
 0xed3   :  { %2675 = vmatprep.mubr.bf16.mxu0 %v2244_v7 }
 0xed4   :  { %2676 = vmatmul.mubr.bf16.vlgmr.msra.gmra.mrb[16].mxu0 %v2243_v61 }
 0xed5   :  { %2687 = vmatpush1.bf16.msra.mxu0 %v3505_v44  ;;  %2718 = vmatprep.mubr.bf16.mxu0 %v2246_v63 }
 0xed6   :  { %2688 = vmatprep.subr.bf16.mxu0 %v3510_v0 }
 0xed9   :  { %2689 = vmatpush1.bf16.msra.mxu0 %v3508_v1 }
 0xeda   :  { %2690 = vmatprep.subr.bf16.mxu0 %v3513_v46 }
 0xedd   :  { %2691 = vmatpush1.bf16.msra.mxu0 %v3511_v47 }
 0xede   :  { %2692 = vmatprep.subr.bf16.mxu0 %v3516_v10 }
 0xee1   :  { %2693 = vmatpush1.bf16.msra.mxu0 %v3514_v2  ;;  %v2765_v2 = vld [vmem:[%s4217_s12] sm:$0x3]  ;;  %s3760_s12 = smov [#allocation13]  }
 0xee2   :  { %2694 = vmatprep.subr.bf16.mxu0 %v3519_v3  ;;  %v2781_v3 = vld [vmem:[%s4218_s13] sm:$0x3]  ;;  %s2806_s20 = sshll.u32 %s3760_s12, 4  ;;  %s2807_s20 = int_to_ptr.vmem [resolvable:$true] %s2806_s20 }
 0xee3   :  { %s3713_s13 = scalar_lea.vmem %s2807_s20, 512  ;;  %p3718_p7 = scmp.lt.s32.totalorder %s2807_s20, %s2807_s20 }
 0xee4   :  { %p3714_p6 = scmp.ne.s32.totalorder %s2807_s20, %s3713_s13  ;;  %p3719_p8 = scmp.lt.s32.totalorder %s3713_s13, %s3713_s13 }
 0xee5   :  { %2695 = vmatpush1.bf16.msra.mxu0 %v3517_v4  ;;  %v2770_v4 = vrot.slane %v2765_v2, %v3940_v9 }
 0xee6   :  { %2696 = vmatprep.subr.bf16.mxu0 %v3522_v37  ;;  %v2774_v37 = vrot.slane %v2765_v2, %v3948_v11  ;;  %p3720_p9 = por %p3719_p8, %p3718_p7 }
 0xee8   :  { %p3721_p10 = pnand %p3720_p9, %p3714_p6 }
 0xee9   :  { %2697 = vmatpush1.bf16.msra.mxu0 %v3520_v5 }
 0xeea   :  { %2698 = vmatprep.subr.bf16.mxu0 %v3525_v12 }
 0xeed   :  { %2699 = vmatpush1.bf16.msra.mxu0 %v3523_v23 }
 0xeee   :  { %2700 = vmatprep.subr.bf16.mxu0 %v3528_v16  ;;  %v2786_v16 = vrot.slane %v2781_v3, %v3940_v9 }
 0xef1   :  { %2701 = vmatpush1.bf16.msra.mxu0 %v3526_v14  ;;  %v2790_v14 = vrot.slane %v2781_v3, %v3948_v11 }
 0xef2   :  { %2702 = vmatprep.subr.bf16.mxu0 %v3531_v15 }
 0xef5   :  { %2703 = vmatpush1.bf16.msra.mxu0 %v3529_v49 }
 0xef6   :  { %2704 = vmatprep.subr.bf16.mxu0 %v3534_v6 }
 0xef9   :  { %2705 = vmatpush1.bf16.msra.mxu0 %v3532_v17 }
 0xefa   :  { %2706 = vmatprep.subr.bf16.mxu0 %v3537_v51 }
 0xefd   :  { %2707 = vmatpush1.bf16.msra.mxu0 %v3535_v18 }
 0xefe   :  { %2708 = vmatprep.subr.bf16.mxu0 %v3540_v19 }
 0xf01   :  { %2709 = vmatpush1.bf16.msra.mxu0 %v3538_v20 }
 0xf02   :  { %2710 = vmatprep.subr.bf16.mxu0 %v3543_v21 }
 0xf05   :  { %2711 = vmatpush1.bf16.msra.mxu0 %v3541_v26 }
 0xf06   :  { %2712 = vmatprep.subr.bf16.mxu0 %v3546_v39 }
 0xf09   :  { %2713 = vmatpush1.bf16.msra.mxu0 %v3544_v27 }
 0xf0a   :  { %2714 = vmatprep.subr.bf16.mxu0 %v3549_v36 }
 0xf0d   :  { %2715 = vmatpush1.bf16.msra.mxu0 %v3547_v28 }
 0xf0e   :  { %2716 = vmatprep.subr.bf16.mxu0 %v3552_v30 }
 0xf11   :  { %2717 = vmatpush1.bf16.msra.mxu0 %v3550_v32 }
 0xf14   :  { %2719 = vmatmul.mubr.bf16.vlgmr.msra.gmra.mrb[16].mxu0 %v4168_v62 }
 0xfe7   :  { %v2720_v22 = vpop.f32.mrb[16].mxu0 }
 0xfe8   :  { %v3145_v35 = vadd.f32 %v2720_v22, %v2316_v29  ;;  %v2722_v38 = vpop.f32.mrb[17].mxu0 }
 0xfe9   :  { %v3146_v48 = vadd.f32 %v2722_v38, %v2320_v31  ;;  %v2724_v40 = vpop.f32.mrb[18].mxu0 }
 0xfea   :  { %v2729_v41 = vadd.f32 %v3145_v35, %v4151_v54  ;;  %v3147_v42 = vadd.f32 %v2724_v40, %v2316_v29  ;;  %v2726_v45 = vpop.f32.mrb[19].mxu0 }
 0xfeb   :  { %v2730_v13 = vadd.f32 %v3146_v48, %v4147_v52  ;;  %v3148_v43 = vadd.f32 %v2726_v45, %v2320_v31 }
 0xfec   :  { %v2731_v24 = vadd.f32 %v3147_v42, %v4153_v55 }
 0xfed   :  { %v2732_v34 = vadd.f32 %v3148_v43, %v4149_v53  ;;  %v2733_v50 = vadd.f32 %v2730_v13, %v2729_v41 }
 0xfef   :  { %2734 = vadd.xlane.f32.xlu0 %v2733_v50  ;;  %v2736_v56 = vadd.f32 %v2732_v34, %v2731_v24 }
 0xff1   :  { %2737 = vadd.xlane.f32.xlu1 %v2736_v56 }
0x107c   :  { %v2735_v8 = vpop.xlane.xlu0 %2734 }
0x107d   :  { %v2739_v25 = vmul.f32 0.00390625, %v2735_v8 }
0x107e   :  { %v2738_v57 = vpop.xlane.xlu1 %2737 }
0x107f   :  { %v2741_v58 = vsub.f32 %v2729_v41, %v2739_v25  ;;  %v2742_v59 = vsub.f32 %v2730_v13, %v2739_v25  ;;  %v2740_v60 = vmul.f32 0.00390625, %v2738_v57 }
0x1081   :  { %v2743_v54 = vsub.f32 %v2731_v24, %v2740_v60  ;;  %v2744_v61 = vsub.f32 %v2732_v34, %v2740_v60  ;;  %v2745_v62 = vmul.f32 %v2741_v58, %v2741_v58  ;;  %v2746_v7 = vmul.f32 %v2742_v59, %v2742_v59 }
0x1083   :  { %v2749_v52 = vadd.f32 %v2746_v7, %v2745_v62  ;;  %v2747_v63 = vmul.f32 %v2743_v54, %v2743_v54  ;;  %v2748_v44 = vmul.f32 %v2744_v61, %v2744_v61 }
0x1085   :  { %2750 = vadd.xlane.f32.xlu0 %v2749_v52  ;;  %v2752_v55 = vadd.f32 %v2748_v44, %v2747_v63 }
0x1087   :  { %2753 = vadd.xlane.f32.xlu1 %v2752_v55 }
0x1112   :  { %v2751_v53 = vpop.xlane.xlu0 %2750 }
0x1113   :  { %v2755_v0 = vmul.f32 0.00390625, %v2751_v53 }
0x1114   :  { %v2754_v1 = vpop.xlane.xlu1 %2753 }
0x1115   :  { %v2757_v46 = vadd.f32 1e-05, %v2755_v0  ;;  %v2756_v47 = vmul.f32 0.00390625, %v2754_v1 }
0x1117   :  { %3573 = vrsqrt.f32 %v2757_v46  ;;  %v2758_v10 = vadd.f32 1e-05, %v2756_v47 }
0x1119   :  { %3575 = vrsqrt.f32 %v2758_v10 }
0x1121   :  { %v3574_v5 = vpop.eup %3573 }
0x1122   :  { %v2761_v12 = vmul.f32 %v3574_v5, %v2741_v58  ;;  %v2762_v23 = vmul.f32 %v3574_v5, %v2742_v59 }
0x1123   :  { %v3576_v15 = vpop.eup %3575 }
0x1124   :  { %v2763_v49 = vmul.f32 %v3576_v15, %v2743_v54  ;;  %v2764_v6 = vmul.f32 %v3576_v15, %v2744_v61  ;;  %v2777_v17 = vmul.f32 %v2770_v4, %v2761_v12  ;;  %v2778_v51 = vmul.f32 %v2774_v37, %v2762_v23 }
0x1126   :  { %v2779_v18 = vmul.f32 %v2770_v4, %v2763_v49  ;;  %v2780_v19 = vmul.f32 %v2774_v37, %v2764_v6  ;;  %v2793_v20 = vadd.f32 %v2786_v16, %v2777_v17  ;;  %v2794_v21 = vadd.f32 %v2790_v14, %v2778_v51 }
0x1128   :  { %v2795_v26 = vadd.f32 %v2786_v16, %v2779_v18  ;;  %v2796_v39 = vadd.f32 %v2790_v14, %v2780_v19  ;;  %2797 = vst [vmem:[#allocation13] sm:$0xff] %v2793_v20  ;;  %2798 = vst [vmem:[#allocation13 + $0x8] sm:$0xff] %v2794_v21 }
0x112a   :  { %2799 = vst [vmem:[#allocation13 + $0x10] sm:$0xff] %v2795_v26  ;;  %2800 = vst [vmem:[#allocation13 + $0x18] sm:$0xff] %v2796_v39 }
0x112b   :  { %3724 = shalt.err (!%p3721_p10)
}
0x112c   :  { %s3725_s22 = scalar_lea.hbm %s4219_s14, 512 }
0x112d   :  { %p3726_p11 = scmp.ne.s32.totalorder %s4219_s14, %s3725_s22  ;;  %p3729_p12 = scmp.lt.u32.totalorder %s3725_s22, %s4219_s14 }
0x112f   :  { %p3731_p13 = pnand %p3729_p12, %p3726_p11 }
0x1131   :  { %3734 = shalt.err (!%p3731_p13)
}
0x1132   :  { %2812 = dma.vmem_to_hbm [thread:$0]  %s2807_s20, 512, %s4219_s14, [#allocation4], %s3750_s4, %s3750_s4, %s3751_s28  }
0x1133   :  { %3743 = dma.done.wait [#allocation4], 512  }
0x1134   :  { %3744 = vsyncadd [#allocation4], 4294966784 }
0x1135   :  { %2816 = vsyncpa [#allocation3], 1 }
0x1136   :  { %2817 = vsyncpa [#allocation6], 1 }
0x1137   :  { %2818 = vsyncpa [#allocation9], 1 }
0x1138   :  { %2819 = vsyncpa [#allocation12], 1 }
0x1139   :  { %2820 = vsyncpa [#allocation4], 1 }

</bundles_post_ra>
